<compile_context>
chip_gen: v7x
topology: tpu7x:2x2x1
jax: 0.10.0
libtpu: 0.0.40
codegen_flags: <defaults>
</compile_context>

<pallas_src>
import functools

import jax
import jax.numpy as jnp
from jax.experimental import pallas as pl
from jax.experimental.pallas import tpu as pltpu


def _round_up(x: int, m: int) -> int:
    return ((x + m - 1) // m) * m


def _cdiv(a: int, b: int) -> int:
    return (a + b - 1) // b


class PallasMLP:
    """One MLP head with zero-padded bf16 weights / f32 biases cached at init.

    Weights are stored pre-transposed, shape (in, out), so the kernel computes
    h @ W + b (equivalent to torch.nn.Linear with W = linear.weight.T).
    """

    def __init__(self, weights, biases, sigmoid_output: bool = False):
        assert len(weights) == len(biases) >= 1
        self.num_layers = len(weights)
        self.sigmoid_output = bool(sigmoid_output)
        self.in_dim = int(weights[0].shape[0])
        self.out_dim = int(weights[-1].shape[1])
        self.in_pad = _round_up(self.in_dim, 128)

        padded, specs, dims = [], [], []
        for w, b in zip(weights, biases):
            n_in, n_out = int(w.shape[0]), int(w.shape[1])
            n_in_p, n_out_p = _round_up(n_in, 128), _round_up(n_out, 128)
            wp = jnp.zeros((n_in_p, n_out_p), jnp.bfloat16).at[:n_in, :n_out].set(
                w.astype(jnp.bfloat16))
            bp = jnp.zeros((1, n_out_p), jnp.float32).at[:, :n_out].set(
                b.astype(jnp.float32))
            padded += [wp, bp]
            # Constant block index -> Pallas keeps these resident in VMEM
            # across grid steps (no re-DMA per batch tile).
            specs.append(pl.BlockSpec((n_in_p, n_out_p), lambda i: (0, 0)))
            specs.append(pl.BlockSpec((1, n_out_p), lambda i: (0, 0)))
            dims.append((n_in, n_out))

        self.padded_params = tuple(jax.block_until_ready(p) for p in padded)
        self.param_specs = specs
        self.out_pad = int(self.padded_params[-2].shape[1])
        self.flops_per_row = 2 * sum(ni * no for ni, no in dims)
        self.param_bytes = sum(int(p.size) * p.dtype.itemsize
                               for p in self.padded_params)


# --------------------------------------------------------------------------
# Batched (grid-pipelined) single-head kernel
# --------------------------------------------------------------------------
def _mlp_kernel(num_layers: int, sigmoid_output: bool, x_ref, *refs):
    """refs = (w0, b0, ..., w_{L-1}, b_{L-1}, out_ref).

    x_ref:  (TB, in_pad)         f32   (cast to bf16 here, per review)
    w_i:    (in_i_pad, out_i_pad) bf16
    b_i:    (1, out_i_pad)        f32
    out:    (TB, out_pad)         out_dtype
    """
    out_ref = refs[-1]
    params = refs[:-1]

    act = x_ref[...].astype(jnp.bfloat16)          # in-kernel cast (no HBM copy)
    acc = None
    for i in range(num_layers):
        w = params[2 * i][...]                     # bf16
        b = params[2 * i + 1][...]                 # f32 (1, out) -> sublane bcast
        acc = jnp.dot(act, w, preferred_element_type=jnp.float32) + b
        if i < num_layers - 1:
            acc = jnp.maximum(acc, 0.0)            # F.relu in f32
            act = acc.astype(jnp.bfloat16)
    if sigmoid_output:
        acc = jax.nn.sigmoid(acc)                  # F.sigmoid (EUP)
    out_ref[...] = acc.astype(out_ref.dtype)


def mlp_forward(x, mlp: PallasMLP, *, block_b: int = 2048,
                out_dtype=jnp.float32, min_grid: int = 1):
    """Batched MLP forward. x: (B, in_dim) f32.  Returns (B, out_dim) out_dtype.

    min_grid: set to 2 on v7x so both TensorCores get a batch tile.
    """
    B, in_dim = x.shape
    assert in_dim == mlp.in_dim, (in_dim, mlp.in_dim)

    sub = 16 if jnp.dtype(out_dtype).itemsize == 2 else 8
    b_min = _round_up(max(B, 1), sub)
    # Even split of the batch: waste < one sublane group per tile.
    n_tiles = _cdiv(b_min, block_b)
    n_tiles = max(n_tiles, min(min_grid, _cdiv(b_min, sub)))
    tb = _round_up(_cdiv(b_min, n_tiles), sub)
    b_pad = tb * n_tiles

    if (b_pad != B) or (mlp.in_pad != in_dim):
        x = jnp.pad(x, ((0, b_pad - B), (0, mlp.in_pad - in_dim)))

    kernel = functools.partial(_mlp_kernel, mlp.num_layers, mlp.sigmoid_output)
    out_itemsize = jnp.dtype(out_dtype).itemsize
    cost = pl.CostEstimate(
        flops=int(b_pad * mlp.flops_per_row),
        transcendentals=int(b_pad * mlp.out_pad) if mlp.sigmoid_output else 0,
        bytes_accessed=int(b_pad * mlp.in_pad * 4 + mlp.param_bytes
                           + b_pad * mlp.out_pad * out_itemsize),
    )

    out = pl.pallas_call(
        kernel,
        out_shape=jax.ShapeDtypeStruct((b_pad, mlp.out_pad), out_dtype),
        grid=(n_tiles,),
        in_specs=[pl.BlockSpec((tb, mlp.in_pad), lambda i: (i, 0))]
                 + list(mlp.param_specs),
        out_specs=pl.BlockSpec((tb, mlp.out_pad), lambda i: (i, 0)),
        compiler_params=pltpu.CompilerParams(dimension_semantics=("parallel",)),
        cost_estimate=cost,
    )(x, *mlp.padded_params)

    # Padded rows/cols (bias-derived values, 0.5 after sigmoid) are discarded
    # here; consumers only ever see the valid slice.
    return out[:B, :mlp.out_dim]


# --------------------------------------------------------------------------
# Fused multi-head kernel: one launch for all available hypernetwork heads
# --------------------------------------------------------------------------
def _fused_heads_kernel(heads_cfg, *refs):
    """heads_cfg: tuple of (num_layers, sigmoid_output, out_dim).

    refs = for each head: x, w0, b0, ..., w_{L-1}, b_{L-1};  then all out refs.
    """
    n_in = sum(1 + 2 * L for (L, _, _) in heads_cfg)
    in_refs, out_refs = refs[:n_in], refs[n_in:]
    p = 0
    for h, (num_layers, sigmoid_output, out_dim) in enumerate(heads_cfg):
        act = in_refs[p][...].astype(jnp.bfloat16)
        p += 1
        acc = None
        for i in range(num_layers):
            w = in_refs[p][...]
            b = in_refs[p + 1][...]
            p += 2
            acc = jnp.dot(act, w, preferred_element_type=jnp.float32) + b
            if i < num_layers - 1:
                acc = jnp.maximum(acc, 0.0)
                act = acc.astype(jnp.bfloat16)
        if sigmoid_output:
            acc = jax.nn.sigmoid(acc)
        if out_dim != acc.shape[1]:
            acc = acc[:, :out_dim]
        out_refs[h][...] = acc.astype(out_refs[h].dtype)


def fused_heads_forward(xs, mlps, *, out_dtype=jnp.float32):
    """Run several MLP heads in a single pallas_call (multiple outputs).

    xs: list of (B_i, in_dim_i) f32; mlps: matching list of PallasMLP.
    Returns a list of (B_i, out_dim_i) arrays.
    """
    args, cfg, out_shapes = [], [], []
    flops = trans = nbytes = 0
    for x, m in zip(xs, mlps):
        B, in_dim = x.shape
        assert in_dim == m.in_dim, (in_dim, m.in_dim)
        if in_dim != m.in_pad:
            x = jnp.pad(x, ((0, 0), (0, m.in_pad - in_dim)))
        args.append(x)
        args.extend(m.padded_params)
        cfg.append((m.num_layers, m.sigmoid_output, m.out_dim))
        out_shapes.append(jax.ShapeDtypeStruct((B, m.out_dim), out_dtype))
        flops += B * m.flops_per_row
        trans += B * m.out_dim if m.sigmoid_output else 0
        nbytes += (int(x.size) * 4 + m.param_bytes
                   + B * m.out_dim * jnp.dtype(out_dtype).itemsize)

    kernel = functools.partial(_fused_heads_kernel, tuple(cfg))
    outs = pl.pallas_call(
        kernel,
        out_shape=tuple(out_shapes),
        cost_estimate=pl.CostEstimate(flops=int(flops),
                                      transcendentals=int(trans),
                                      bytes_accessed=int(nbytes)),
    )(*args)
    return list(outs)


# --------------------------------------------------------------------------
# Reference + init helpers
# --------------------------------------------------------------------------
def init_mlp_params(key, input_dim, hidden_dim, output_dim, num_layers):
    """Deterministic init mirroring nn.Linear's shapes (weights pre-transposed)."""
    h = [hidden_dim] * (num_layers - 1)
    in_dims = [input_dim] + h
    out_dims = h + [output_dim]
    weights, biases = [], []
    for n_in, n_out in zip(in_dims, out_dims):
        key, kw, kb = jax.random.split(key, 3)
        bound = 1.0 / jnp.sqrt(jnp.float32(n_in))
        weights.append(jax.random.uniform(kw, (n_in, n_out), jnp.float32, -bound, bound))
        biases.append(jax.random.uniform(kb, (n_out,), jnp.float32, -bound, bound))
    return weights, biases


def mlp_reference(x, weights, biases, sigmoid_output=False):
    """Plain-JAX reference matching the PyTorch forward, mirroring the kernel's
    bf16 MXU operands with f32 accumulation."""
    h = x.astype(jnp.bfloat16)
    n = len(weights)
    for i, (w, b) in enumerate(zip(weights, biases)):
        acc = jnp.dot(h, w.astype(jnp.bfloat16),
                      preferred_element_type=jnp.float32) + b.astype(jnp.float32)
        if i < n - 1:
            acc = jnp.maximum(acc, 0.0)
            h = acc.astype(jnp.bfloat16)
        else:
            h = acc
    if sigmoid_output:
        h = jax.nn.sigmoid(h)
    return h


if __name__ == "__main__":
    key = jax.random.PRNGKey(0)
    tdim = 32          # transformer_dim
    n_tokens = 8       # number of ac tokens feeding the hypernetwork heads

    # ---- build the three MaskDecoder2 heads once (params padded/cached) ----
    key, k1, k2, k3 = jax.random.split(key, 4)
    w_sam, b_sam = init_mlp_params(k1, tdim * 8, tdim * 8, tdim * 4, 3)  # 256->256->128
    w_h1, b_h1 = init_mlp_params(k2, tdim * 4, tdim * 8, tdim * 4, 3)    # 128->256->128
    w_h2, b_h2 = init_mlp_params(k3, tdim * 4, tdim * 8, tdim * 2, 3)    # 128->256->64
    head_sam = PallasMLP(w_sam, b_sam)
    head_1 = PallasMLP(w_h1, b_h1)
    head_2 = PallasMLP(w_h2, b_h2)

    key, kx1, kx2, kx3 = jax.random.split(key, 4)
    x_sam = jax.random.normal(kx1, (n_tokens, tdim * 8), jnp.float32)
    x_h1 = jax.random.normal(kx2, (n_tokens, tdim * 4), jnp.float32)
    x_h2 = jax.random.normal(kx3, (n_tokens, tdim * 4), jnp.float32)

    # ---- fused launch: all three heads in ONE pallas_call ------------------
    y_sam, y_h1, y_h2 = fused_heads_forward(
        [x_sam, x_h1, x_h2], [head_sam, head_1, head_2])
    jax.block_until_ready((y_sam, y_h1, y_h2))
    r_sam = mlp_reference(x_sam, w_sam, b_sam)
    r_h1 = mlp_reference(x_h1, w_h1, b_h1)
    r_h2 = mlp_reference(x_h2, w_h2, b_h2)
    assert y_sam.shape == (n_tokens, tdim * 4)
    assert y_h1.shape == (n_tokens, tdim * 4)
    assert y_h2.shape == (n_tokens, tdim * 2)
    assert jnp.allclose(y_sam, r_sam, atol=2e-2, rtol=2e-2), "fused head_sam mismatch"
    assert jnp.allclose(y_h1, r_h1, atol=2e-2, rtol=2e-2), "fused head_1 mismatch"
    assert jnp.allclose(y_h2, r_h2, atol=2e-2, rtol=2e-2), "fused head_2 mismatch"

    # ---- batched grid path: awkward batch (520) splits evenly (no 2x pad) --
    key, kxb = jax.random.split(key)
    xb = jax.random.normal(kxb, (520, tdim * 8), jnp.float32)
    yb = jax.block_until_ready(mlp_forward(xb, head_sam, block_b=512, min_grid=2))
    rb = mlp_reference(xb, w_sam, b_sam)
    assert yb.shape == (520, tdim * 4)
    assert jnp.allclose(yb, rb, atol=2e-2, rtol=2e-2), "batched head_sam mismatch"

    # ---- bf16-output + sigmoid path (out_dtype knob) ------------------------
    key, kp4, kx4 = jax.random.split(key, 3)
    w_sig, b_sig = init_mlp_params(kp4, tdim * 4, tdim * 8, tdim * 2, 3)
    head_sig = PallasMLP(w_sig, b_sig, sigmoid_output=True)
    xs = jax.random.normal(kx4, (40, tdim * 4), jnp.float32)
    ys = jax.block_until_ready(mlp_forward(xs, head_sig, out_dtype=jnp.bfloat16))
    rs = mlp_reference(xs, w_sig, b_sig, sigmoid_output=True).astype(jnp.bfloat16)
    assert ys.shape == (40, tdim * 2) and ys.dtype == jnp.bfloat16
    assert jnp.allclose(ys.astype(jnp.float32), rs.astype(jnp.float32),
                        atol=2e-2, rtol=2e-2), "sigmoid/bf16 head mismatch"

    print("KERNEL_OK")
</pallas_src>

<mosaic_0001>
module attributes {stable_mosaic.version = 11 : i64} {
  func.func @_fused_heads_kernel(%arg0: memref<8x256xf32, #tpu.memory_space<vmem>>, %arg1: memref<256x256xbf16, #tpu.memory_space<vmem>>, %arg2: memref<1x256xf32, #tpu.memory_space<vmem>>, %arg3: memref<256x256xbf16, #tpu.memory_space<vmem>>, %arg4: memref<1x256xf32, #tpu.memory_space<vmem>>, %arg5: memref<256x128xbf16, #tpu.memory_space<vmem>>, %arg6: memref<1x128xf32, #tpu.memory_space<vmem>>, %arg7: memref<8x128xf32, #tpu.memory_space<vmem>>, %arg8: memref<128x256xbf16, #tpu.memory_space<vmem>>, %arg9: memref<1x256xf32, #tpu.memory_space<vmem>>, %arg10: memref<256x256xbf16, #tpu.memory_space<vmem>>, %arg11: memref<1x256xf32, #tpu.memory_space<vmem>>, %arg12: memref<256x128xbf16, #tpu.memory_space<vmem>>, %arg13: memref<1x128xf32, #tpu.memory_space<vmem>>, %arg14: memref<8x128xf32, #tpu.memory_space<vmem>>, %arg15: memref<128x256xbf16, #tpu.memory_space<vmem>>, %arg16: memref<1x256xf32, #tpu.memory_space<vmem>>, %arg17: memref<256x256xbf16, #tpu.memory_space<vmem>>, %arg18: memref<1x256xf32, #tpu.memory_space<vmem>>, %arg19: memref<256x128xbf16, #tpu.memory_space<vmem>>, %arg20: memref<1x128xf32, #tpu.memory_space<vmem>>, %arg21: memref<8x128xf32, #tpu.memory_space<vmem>>, %arg22: memref<8x128xf32, #tpu.memory_space<vmem>>, %arg23: memref<8x64xf32, #tpu.memory_space<vmem>>) attributes {dimension_semantics = [], scalar_prefetch = 0 : i64, scratch_operands = 0 : i64, tpu.core_type = #tpu.core_type<tc>} {
    %c0 = arith.constant 0 : index
    %c0_0 = arith.constant 0 : index
    %0 = vector.load %arg0[%c0, %c0_0] : memref<8x256xf32, #tpu.memory_space<vmem>>, vector<8x256xf32>
    %1 = arith.truncf %0 : vector<8x256xf32> to vector<8x256xbf16>
    %c0_1 = arith.constant 0 : index
    %c0_2 = arith.constant 0 : index
    %2 = vector.load %arg1[%c0_1, %c0_2] : memref<256x256xbf16, #tpu.memory_space<vmem>>, vector<256x256xbf16>
    %c0_3 = arith.constant 0 : index
    %c0_4 = arith.constant 0 : index
    %3 = vector.load %arg2[%c0_3, %c0_4] : memref<1x256xf32, #tpu.memory_space<vmem>>, vector<1x256xf32>
    %cst = arith.constant dense<0.000000e+00> : vector<8x256xf32>
    %4 = tpu.matmul %1, %2, %cst {dimension_numbers = #tpu.dot_dimension_numbers<[1], [0], [0], [1], [0, 0, 1, 1], [], []>} : vector<8x256xbf16>, vector<256x256xbf16>, vector<8x256xf32> -> vector<8x256xf32>
    %5 = vector.broadcast %3 : vector<1x256xf32> to vector<8x256xf32>
    %6 = arith.addf %4, %5 : vector<8x256xf32>
    %cst_5 = arith.constant 0.000000e+00 : f32
    %7 = vector.broadcast %cst_5 : f32 to vector<8x256xf32>
    %8 = arith.maximumf %6, %7 : vector<8x256xf32>
    %9 = arith.truncf %8 : vector<8x256xf32> to vector<8x256xbf16>
    %c0_6 = arith.constant 0 : index
    %c0_7 = arith.constant 0 : index
    %10 = vector.load %arg3[%c0_6, %c0_7] : memref<256x256xbf16, #tpu.memory_space<vmem>>, vector<256x256xbf16>
    %c0_8 = arith.constant 0 : index
    %c0_9 = arith.constant 0 : index
    %11 = vector.load %arg4[%c0_8, %c0_9] : memref<1x256xf32, #tpu.memory_space<vmem>>, vector<1x256xf32>
    %cst_10 = arith.constant dense<0.000000e+00> : vector<8x256xf32>
    %12 = tpu.matmul %9, %10, %cst_10 {dimension_numbers = #tpu.dot_dimension_numbers<[1], [0], [0], [1], [0, 0, 1, 1], [], []>} : vector<8x256xbf16>, vector<256x256xbf16>, vector<8x256xf32> -> vector<8x256xf32>
    %13 = vector.broadcast %11 : vector<1x256xf32> to vector<8x256xf32>
    %14 = arith.addf %12, %13 : vector<8x256xf32>
    %cst_11 = arith.constant 0.000000e+00 : f32
    %15 = vector.broadcast %cst_11 : f32 to vector<8x256xf32>
    %16 = arith.maximumf %14, %15 : vector<8x256xf32>
    %17 = arith.truncf %16 : vector<8x256xf32> to vector<8x256xbf16>
    %c0_12 = arith.constant 0 : index
    %c0_13 = arith.constant 0 : index
    %18 = vector.load %arg5[%c0_12, %c0_13] : memref<256x128xbf16, #tpu.memory_space<vmem>>, vector<256x128xbf16>
    %c0_14 = arith.constant 0 : index
    %c0_15 = arith.constant 0 : index
    %19 = vector.load %arg6[%c0_14, %c0_15] : memref<1x128xf32, #tpu.memory_space<vmem>>, vector<1x128xf32>
    %cst_16 = arith.constant dense<0.000000e+00> : vector<8x128xf32>
    %20 = tpu.matmul %17, %18, %cst_16 {dimension_numbers = #tpu.dot_dimension_numbers<[1], [0], [0], [1], [0, 0, 1, 1], [], []>} : vector<8x256xbf16>, vector<256x128xbf16>, vector<8x128xf32> -> vector<8x128xf32>
    %21 = vector.broadcast %19 : vector<1x128xf32> to vector<8x128xf32>
    %22 = arith.addf %20, %21 : vector<8x128xf32>
    %c0_17 = arith.constant 0 : index
    %c0_18 = arith.constant 0 : index
    %23 = vector.load %arg21[%c0_17, %c0_18] : memref<8x128xf32, #tpu.memory_space<vmem>>, vector<8x128xf32>
    tpu.vector_store %arg21[%c0_17, %c0_18], %22 {strides = array<i32>} : memref<8x128xf32, #tpu.memory_space<vmem>>, vector<8x128xf32>,
    %c0_19 = arith.constant 0 : index
    %c0_20 = arith.constant 0 : index
    %24 = vector.load %arg7[%c0_19, %c0_20] : memref<8x128xf32, #tpu.memory_space<vmem>>, vector<8x128xf32>
    %25 = arith.truncf %24 : vector<8x128xf32> to vector<8x128xbf16>
    %c0_21 = arith.constant 0 : index
    %c0_22 = arith.constant 0 : index
    %26 = vector.load %arg8[%c0_21, %c0_22] : memref<128x256xbf16, #tpu.memory_space<vmem>>, vector<128x256xbf16>
    %c0_23 = arith.constant 0 : index
    %c0_24 = arith.constant 0 : index
    %27 = vector.load %arg9[%c0_23, %c0_24] : memref<1x256xf32, #tpu.memory_space<vmem>>, vector<1x256xf32>
    %cst_25 = arith.constant dense<0.000000e+00> : vector<8x256xf32>
    %28 = tpu.matmul %25, %26, %cst_25 {dimension_numbers = #tpu.dot_dimension_numbers<[1], [0], [0], [1], [0, 0, 1, 1], [], []>} : vector<8x128xbf16>, vector<128x256xbf16>, vector<8x256xf32> -> vector<8x256xf32>
    %29 = vector.broadcast %27 : vector<1x256xf32> to vector<8x256xf32>
    %30 = arith.addf %28, %29 : vector<8x256xf32>
    %cst_26 = arith.constant 0.000000e+00 : f32
    %31 = vector.broadcast %cst_26 : f32 to vector<8x256xf32>
    %32 = arith.maximumf %30, %31 : vector<8x256xf32>
    %33 = arith.truncf %32 : vector<8x256xf32> to vector<8x256xbf16>
    %c0_27 = arith.constant 0 : index
    %c0_28 = arith.constant 0 : index
    %34 = vector.load %arg10[%c0_27, %c0_28] : memref<256x256xbf16, #tpu.memory_space<vmem>>, vector<256x256xbf16>
    %c0_29 = arith.constant 0 : index
    %c0_30 = arith.constant 0 : index
    %35 = vector.load %arg11[%c0_29, %c0_30] : memref<1x256xf32, #tpu.memory_space<vmem>>, vector<1x256xf32>
    %cst_31 = arith.constant dense<0.000000e+00> : vector<8x256xf32>
    %36 = tpu.matmul %33, %34, %cst_31 {dimension_numbers = #tpu.dot_dimension_numbers<[1], [0], [0], [1], [0, 0, 1, 1], [], []>} : vector<8x256xbf16>, vector<256x256xbf16>, vector<8x256xf32> -> vector<8x256xf32>
    %37 = vector.broadcast %35 : vector<1x256xf32> to vector<8x256xf32>
    %38 = arith.addf %36, %37 : vector<8x256xf32>
    %cst_32 = arith.constant 0.000000e+00 : f32
    %39 = vector.broadcast %cst_32 : f32 to vector<8x256xf32>
    %40 = arith.maximumf %38, %39 : vector<8x256xf32>
    %41 = arith.truncf %40 : vector<8x256xf32> to vector<8x256xbf16>
    %c0_33 = arith.constant 0 : index
    %c0_34 = arith.constant 0 : index
    %42 = vector.load %arg12[%c0_33, %c0_34] : memref<256x128xbf16, #tpu.memory_space<vmem>>, vector<256x128xbf16>
    %c0_35 = arith.constant 0 : index
    %c0_36 = arith.constant 0 : index
    %43 = vector.load %arg13[%c0_35, %c0_36] : memref<1x128xf32, #tpu.memory_space<vmem>>, vector<1x128xf32>
    %cst_37 = arith.constant dense<0.000000e+00> : vector<8x128xf32>
    %44 = tpu.matmul %41, %42, %cst_37 {dimension_numbers = #tpu.dot_dimension_numbers<[1], [0], [0], [1], [0, 0, 1, 1], [], []>} : vector<8x256xbf16>, vector<256x128xbf16>, vector<8x128xf32> -> vector<8x128xf32>
    %45 = vector.broadcast %43 : vector<1x128xf32> to vector<8x128xf32>
    %46 = arith.addf %44, %45 : vector<8x128xf32>
    %c0_38 = arith.constant 0 : index
    %c0_39 = arith.constant 0 : index
    %47 = vector.load %arg22[%c0_38, %c0_39] : memref<8x128xf32, #tpu.memory_space<vmem>>, vector<8x128xf32>
    tpu.vector_store %arg22[%c0_38, %c0_39], %46 {strides = array<i32>} : memref<8x128xf32, #tpu.memory_space<vmem>>, vector<8x128xf32>,
    %c0_40 = arith.constant 0 : index
    %c0_41 = arith.constant 0 : index
    %48 = vector.load %arg14[%c0_40, %c0_41] : memref<8x128xf32, #tpu.memory_space<vmem>>, vector<8x128xf32>
    %49 = arith.truncf %48 : vector<8x128xf32> to vector<8x128xbf16>
    %c0_42 = arith.constant 0 : index
    %c0_43 = arith.constant 0 : index
    %50 = vector.load %arg15[%c0_42, %c0_43] : memref<128x256xbf16, #tpu.memory_space<vmem>>, vector<128x256xbf16>
    %c0_44 = arith.constant 0 : index
    %c0_45 = arith.constant 0 : index
    %51 = vector.load %arg16[%c0_44, %c0_45] : memref<1x256xf32, #tpu.memory_space<vmem>>, vector<1x256xf32>
    %cst_46 = arith.constant dense<0.000000e+00> : vector<8x256xf32>
    %52 = tpu.matmul %49, %50, %cst_46 {dimension_numbers = #tpu.dot_dimension_numbers<[1], [0], [0], [1], [0, 0, 1, 1], [], []>} : vector<8x128xbf16>, vector<128x256xbf16>, vector<8x256xf32> -> vector<8x256xf32>
    %53 = vector.broadcast %51 : vector<1x256xf32> to vector<8x256xf32>
    %54 = arith.addf %52, %53 : vector<8x256xf32>
    %cst_47 = arith.constant 0.000000e+00 : f32
    %55 = vector.broadcast %cst_47 : f32 to vector<8x256xf32>
    %56 = arith.maximumf %54, %55 : vector<8x256xf32>
    %57 = arith.truncf %56 : vector<8x256xf32> to vector<8x256xbf16>
    %c0_48 = arith.constant 0 : index
    %c0_49 = arith.constant 0 : index
    %58 = vector.load %arg17[%c0_48, %c0_49] : memref<256x256xbf16, #tpu.memory_space<vmem>>, vector<256x256xbf16>
    %c0_50 = arith.constant 0 : index
    %c0_51 = arith.constant 0 : index
    %59 = vector.load %arg18[%c0_50, %c0_51] : memref<1x256xf32, #tpu.memory_space<vmem>>, vector<1x256xf32>
    %cst_52 = arith.constant dense<0.000000e+00> : vector<8x256xf32>
    %60 = tpu.matmul %57, %58, %cst_52 {dimension_numbers = #tpu.dot_dimension_numbers<[1], [0], [0], [1], [0, 0, 1, 1], [], []>} : vector<8x256xbf16>, vector<256x256xbf16>, vector<8x256xf32> -> vector<8x256xf32>
    %61 = vector.broadcast %59 : vector<1x256xf32> to vector<8x256xf32>
    %62 = arith.addf %60, %61 : vector<8x256xf32>
    %cst_53 = arith.constant 0.000000e+00 : f32
    %63 = vector.broadcast %cst_53 : f32 to vector<8x256xf32>
    %64 = arith.maximumf %62, %63 : vector<8x256xf32>
    %65 = arith.truncf %64 : vector<8x256xf32> to vector<8x256xbf16>
    %c0_54 = arith.constant 0 : index
    %c0_55 = arith.constant 0 : index
    %66 = vector.load %arg19[%c0_54, %c0_55] : memref<256x128xbf16, #tpu.memory_space<vmem>>, vector<256x128xbf16>
    %c0_56 = arith.constant 0 : index
    %c0_57 = arith.constant 0 : index
    %67 = vector.load %arg20[%c0_56, %c0_57] : memref<1x128xf32, #tpu.memory_space<vmem>>, vector<1x128xf32>
    %cst_58 = arith.constant dense<0.000000e+00> : vector<8x128xf32>
    %68 = tpu.matmul %65, %66, %cst_58 {dimension_numbers = #tpu.dot_dimension_numbers<[1], [0], [0], [1], [0, 0, 1, 1], [], []>} : vector<8x256xbf16>, vector<256x128xbf16>, vector<8x128xf32> -> vector<8x128xf32>
    %69 = vector.broadcast %67 : vector<1x128xf32> to vector<8x128xf32>
    %70 = arith.addf %68, %69 : vector<8x128xf32>
    %71 = vector.extract_strided_slice %70 {offsets = [0, 0], sizes = [8, 64], strides = [1, 1]} : vector<8x128xf32> to vector<8x64xf32>
    %c0_59 = arith.constant 0 : index
    %c0_60 = arith.constant 0 : index
    %72 = vector.load %arg23[%c0_59, %c0_60] : memref<8x64xf32, #tpu.memory_space<vmem>>, vector<8x64xf32>
    tpu.vector_store %arg23[%c0_59, %c0_60], %71 {strides = array<i32>} : memref<8x64xf32, #tpu.memory_space<vmem>>, vector<8x64xf32>,
    return
  }
}

</mosaic_0001>

<bundles_post_ra>
// kernel: tpu_custom_call.1
= control target key start
LH: loop header
LB: loop body
LE: loop exit
PB: predicated region body
PF: predicated region fallthrough
CT: control target
= control target key end

     0   :  { %s3457_s0 = inlined_call_operand.hbm [shape: f32[8,256], index: 0, kind: input, shape index: {}]   ;;  %s3458_s1 = inlined_call_operand.hbm [shape: bf16[256,256], index: 1, kind: input, shape index: {}]   ;;  %s3459_s2 = inlined_call_operand.vmem [shape: f32[1,256], index: 2, kind: input, shape index: {}]   ;;  %s3460_s3 = inlined_call_operand.hbm [shape: bf16[256,256], index: 3, kind: input, shape index: {}]   ;;  %s3461_s4 = inlined_call_operand.hbm [shape: f32[1,256], index: 4, kind: input, shape index: {}]   ;;  %s3462_s5 = inlined_call_operand.hbm [shape: bf16[256,128], index: 5, kind: input, shape index: {}]   ;;  %s3463_s6 = inlined_call_operand.hbm [shape: f32[1,128], index: 6, kind: input, shape index: {}]   ;;  %s3464_s7 = inlined_call_operand.vmem [shape: f32[8,128], index: 7, kind: input, shape index: {}]   ;;  %s3465_s8 = inlined_call_operand.hbm [shape: bf16[128,256], index: 8, kind: input, shape index: {}]   ;;  %s3466_s9 = inlined_call_operand.vmem [shape: f32[1,256], index: 9, kind: input, shape index: {}]   ;;  %s3467_s10 = inlined_call_operand.hbm [shape: bf16[256,256], index: 10, kind: input, shape index: {}]   ;;  %s3468_s11 = inlined_call_operand.vmem [shape: f32[1,256], index: 11, kind: input, shape index: {}]   ;;  %s3469_s12 = inlined_call_operand.hbm [shape: bf16[256,128], index: 12, kind: input, shape index: {}]   ;;  %s3470_s13 = inlined_call_operand.vmem [shape: f32[1,128], index: 13, kind: input, shape index: {}]   ;;  %s3471_s14 = inlined_call_operand.vmem [shape: f32[8,128], index: 14, kind: input, shape index: {}]   ;;  %s3472_s15 = inlined_call_operand.hbm [shape: bf16[128,256], index: 15, kind: input, shape index: {}]   ;;  %s3473_s16 = inlined_call_operand.vmem [shape: f32[1,256], index: 16, kind: input, shape index: {}]   ;;  %s3474_s17 = inlined_call_operand.hbm [shape: bf16[256,256], index: 17, kind: input, shape index: {}]   ;;  %s3475_s18 = inlined_call_operand.vmem [shape: f32[1,256], index: 18, kind: input, shape index: {}]   ;;  %s3476_s19 = inlined_call_operand.hbm [shape: bf16[256,128], index: 19, kind: input, shape index: {}]   ;;  %s3477_s20 = inlined_call_operand.vmem [shape: f32[1,128], index: 20, kind: input, shape index: {}]   ;;  %s3478_s21 = inlined_call_operand.hbm [shape: f32[8,128], index: 21, kind: output, shape index: {0}]   ;;  %s3479_s22 = inlined_call_operand.hbm [shape: f32[8,128], index: 22, kind: output, shape index: {1}]   ;;  %s3480_s23 = inlined_call_operand.hbm [shape: f32[8,64], index: 23, kind: output, shape index: {2}]  }
   0x1   :  { %3489 = sst [smem:[#allocation35_spill]] %s3457_s0 }
   0x2   :  { %3490 = sst [smem:[#allocation36_spill]] %s3458_s1 }
   0x3   :  { %3491 = sst [smem:[#allocation37_spill]] %s3459_s2 }
   0x4   :  { %3492 = sst [smem:[#allocation38_spill]] %s3460_s3 }
   0x5   :  { %3493 = sst [smem:[#allocation39_spill]] %s3461_s4 }
   0x6   :  { %3494 = sst [smem:[#allocation40_spill]] %s3462_s5 }
   0x7   :  { %3495 = sst [smem:[#allocation41_spill]] %s3463_s6 }
   0x8   :  { %3496 = sst [smem:[#allocation42_spill]] %s3464_s7 }
   0x9   :  { %3497 = sst [smem:[#allocation43_spill]] %s3477_s20 }
   0xa   :  { %3498 = sst [smem:[#allocation44_spill]] %s3478_s21 }
   0xb   :  { %3499 = sst [smem:[#allocation45_spill]] %s3480_s23 }
   0xc   :  { %29 = vsyncpa [#allocation3], 0 }
   0xd   :  { %30 = vsyncpa [#allocation6], 0 }
   0xe   :  { %31 = vsyncpa [#allocation9], 0 }
   0xf   :  { %32 = vsyncpa [#allocation12], 0 }
  0x10   :  { %33 = vsyncpa [#allocation15], 0 }
  0x11   :  { %34 = vsyncpa [#allocation18], 0 }
  0x12   :  { %35 = vsyncpa [#allocation21], 0 }
  0x13   :  { %36 = vsyncpa [#allocation4], 0 }
  0x14   :  { %37 = vsyncpa [#allocation24], 0  ;;  %s3051_s4 = smov [#allocation5]   ;;  %s3500_s5 = sld [smem:[#allocation36_spill]] }
  0x15   :  { %s53_s30 = sshll.u32 %s3051_s4, 4  ;;  %s54_s30 = int_to_ptr.vmem [resolvable:$true] %s53_s30 }
  0x1a   :  { %s2703_s1 = scalar_lea.hbm %s3500_s5, 4096 }
  0x1b   :  { %p2704_p0 = scmp.ne.s32.totalorder %s3500_s5, %s2703_s1  ;;  %p2707_p1 = scmp.lt.u32.totalorder %s2703_s1, %s3500_s5 }
  0x1d   :  { %p2709_p2 = pnand %p2707_p1, %p2704_p0 }
  0x1f   :  { %2712 = shalt.err (!%p2709_p2)
}
  0x20   :  { %s2713_s7 = scalar_lea.vmem %s54_s30, 4096  ;;  %p2718_p4 = scmp.lt.s32.totalorder %s54_s30, %s54_s30 }
  0x21   :  { %p2714_p3 = scmp.ne.s32.totalorder %s54_s30, %s2713_s7  ;;  %p2719_p5 = scmp.lt.s32.totalorder %s2713_s7, %s2713_s7 }
  0x23   :  { %p2720_p6 = por %p2719_p5, %p2718_p4 }
  0x25   :  { %p2721_p7 = pnand %p2720_p6, %p2714_p3 }
  0x27   :  { %2724 = shalt.err (!%p2721_p7)
}
  0x28   :  { %s3052_s28 = smov 128   ;;  %s3053_s29 = smov 8  }
  0x29   :  { %59 = dma.hbm_to_vmem [thread:$0]  %s3500_s5, 4096, %s54_s30, [#allocation6], %s3052_s28, %s3052_s28, %s3053_s29  }
  0x2a   :  { %s3054_s4 = smov [#allocation8]   ;;  %s3055_s25 = smov [#allocation11]  }
  0x2b   :  { %s80_s24 = sshll.u32 %s3054_s4, 4  ;;  %s102_s1 = sshll.u32 %s3055_s25, 4  ;;  %s81_s24 = int_to_ptr.vmem [resolvable:$true] %s80_s24  ;;  %s103_s1 = int_to_ptr.vmem [resolvable:$true] %s102_s1 }
  0x2c   :  { %s3501_s6 = sld [smem:[#allocation39_spill]] }
  0x32   :  { %s2725_s27 = scalar_lea.hbm %s3501_s6, 32 }
  0x33   :  { %p2726_p8 = scmp.ne.s32.totalorder %s3501_s6, %s2725_s27  ;;  %p2729_p9 = scmp.lt.u32.totalorder %s2725_s27, %s3501_s6 }
  0x35   :  { %p2731_p10 = pnand %p2729_p9, %p2726_p8 }
  0x37   :  { %2734 = shalt.err (!%p2731_p10)
}
  0x38   :  { %s2735_s30 = scalar_lea.vmem %s81_s24, 32  ;;  %p2740_p12 = scmp.lt.s32.totalorder %s81_s24, %s81_s24 }
  0x39   :  { %p2736_p11 = scmp.ne.s32.totalorder %s81_s24, %s2735_s30  ;;  %p2741_p13 = scmp.lt.s32.totalorder %s2735_s30, %s2735_s30 }
  0x3b   :  { %p2742_p0 = por %p2741_p13, %p2740_p12 }
  0x3d   :  { %p2743_p1 = pnand %p2742_p0, %p2736_p11 }
  0x3f   :  { %2746 = shalt.err (!%p2743_p1)
}
  0x40   :  { %83 = dma.hbm_to_vmem [thread:$0]  %s3501_s6, 32, %s81_s24, [#allocation9]  }
  0x41   :  { %s3502_s4 = sld [smem:[#allocation41_spill]] }
  0x47   :  { %s2747_s25 = scalar_lea.hbm %s3502_s4, 16 }
  0x48   :  { %p2748_p2 = scmp.ne.s32.totalorder %s3502_s4, %s2747_s25  ;;  %p2751_p3 = scmp.lt.u32.totalorder %s2747_s25, %s3502_s4 }
  0x4a   :  { %p2753_p4 = pnand %p2751_p3, %p2748_p2 }
  0x4c   :  { %2756 = shalt.err (!%p2753_p4)
}
  0x4d   :  { %s2757_s27 = scalar_lea.vmem %s103_s1, 16  ;;  %s2761_s7 = scalar_lea.vmem %s103_s1, 32 }
  0x4e   :  { %p2758_p5 = scmp.ne.s32.totalorder %s103_s1, %s2757_s27  ;;  %p2762_p6 = scmp.lt.s32.totalorder %s103_s1, %s103_s1 }
  0x4f   :  { %p2763_p7 = scmp.lt.s32.totalorder %s2761_s7, %s2757_s27 }
  0x51   :  { %p2764_p8 = por %p2763_p7, %p2762_p6 }
  0x53   :  { %p2765_p9 = pnand %p2764_p8, %p2758_p5 }
  0x55   :  { %2768 = shalt.err (!%p2765_p9)
}
  0x56   :  { %105 = dma.hbm_to_vmem [thread:$0]  %s3502_s4, 16, %s103_s1, [#allocation12]  }
  0x57   :  { %s3056_s30 = smov [#allocation14]   ;;  %s3057_s3 = smov [#allocation17]  }
  0x58   :  { %s127_s5 = sshll.u32 %s3056_s30, 4  ;;  %s157_s23 = sshll.u32 %s3057_s3, 4  ;;  %s128_s5 = int_to_ptr.vmem [resolvable:$true] %s127_s5  ;;  %s158_s23 = int_to_ptr.vmem [resolvable:$true] %s157_s23 }
  0x59   :  { %s2769_s20 = scalar_lea.hbm %s3467_s10, 4096 }
  0x5a   :  { %p2770_p10 = scmp.ne.s32.totalorder %s3467_s10, %s2769_s20  ;;  %p2773_p11 = scmp.lt.u32.totalorder %s2769_s20, %s3467_s10 }
  0x5c   :  { %p2775_p12 = pnand %p2773_p11, %p2770_p10 }
  0x5e   :  { %2778 = shalt.err (!%p2775_p12)
}
  0x5f   :  { %s2779_s1 = scalar_lea.vmem %s128_s5, 4096  ;;  %p2784_p0 = scmp.lt.s32.totalorder %s128_s5, %s128_s5 }
  0x60   :  { %p2780_p13 = scmp.ne.s32.totalorder %s128_s5, %s2779_s1  ;;  %p2785_p1 = scmp.lt.s32.totalorder %s2779_s1, %s2779_s1 }
  0x62   :  { %p2786_p2 = por %p2785_p1, %p2784_p0 }
  0x64   :  { %p2787_p3 = pnand %p2786_p2, %p2780_p13 }
  0x66   :  { %2790 = shalt.err (!%p2787_p3)
}
  0x67   :  { %133 = dma.hbm_to_vmem [thread:$0]  %s3467_s10, 4096, %s128_s5, [#allocation15], %s3052_s28, %s3052_s28, %s3053_s29  }
  0x68   :  { %s2791_s30 = scalar_lea.hbm %s3472_s15, 2048 }
  0x69   :  { %p2792_p4 = scmp.ne.s32.totalorder %s3472_s15, %s2791_s30  ;;  %p2795_p5 = scmp.lt.u32.totalorder %s2791_s30, %s3472_s15 }
  0x6b   :  { %p2797_p6 = pnand %p2795_p5, %p2792_p4 }
  0x6d   :  { %2800 = shalt.err (!%p2797_p6)
}
  0x6e   :  { %s2801_s21 = scalar_lea.vmem %s158_s23, 2048  ;;  %p2806_p8 = scmp.lt.s32.totalorder %s158_s23, %s158_s23 }
  0x6f   :  { %p2802_p7 = scmp.ne.s32.totalorder %s158_s23, %s2801_s21  ;;  %p2807_p9 = scmp.lt.s32.totalorder %s2801_s21, %s2801_s21 }
  0x71   :  { %p2808_p10 = por %p2807_p9, %p2806_p8 }
  0x73   :  { %p2809_p11 = pnand %p2808_p10, %p2802_p7 }
  0x75   :  { %2812 = shalt.err (!%p2809_p11)
}
  0x76   :  { %163 = dma.hbm_to_vmem [thread:$0]  %s3472_s15, 2048, %s158_s23, [#allocation18], %s3052_s28, %s3052_s28, %s3053_s29  }
  0x77   :  { %s3058_s26 = smov [#allocation2]   ;;  %s3059_s27 = smov [#allocation7]  }
  0x78   :  { %s44_s2 = sshll.u32 %s3058_s26, 4  ;;  %s67_s1 = sshll.u32 %s3059_s27, 4  ;;  %s45_s2 = int_to_ptr.vmem [resolvable:$true] %s44_s2  ;;  %s68_s1 = int_to_ptr.vmem [resolvable:$true] %s67_s1 }
  0x79   :  { %s3503_s24 = sld [smem:[#allocation35_spill]] }
  0x7f   :  { %s2813_s6 = scalar_lea.hbm %s3503_s24, 256 }
  0x80   :  { %p2814_p12 = scmp.ne.s32.totalorder %s3503_s24, %s2813_s6  ;;  %p2817_p13 = scmp.lt.u32.totalorder %s2813_s6, %s3503_s24 }
  0x82   :  { %p2819_p0 = pnand %p2817_p13, %p2814_p12 }
  0x84   :  { %2822 = shalt.err (!%p2819_p0)
}
  0x85   :  { %s2823_s15 = scalar_lea.vmem %s45_s2, 256  ;;  %p2828_p2 = scmp.lt.s32.totalorder %s45_s2, %s45_s2 }
  0x86   :  { %p2824_p1 = scmp.ne.s32.totalorder %s45_s2, %s2823_s15  ;;  %p2829_p3 = scmp.lt.s32.totalorder %s2823_s15, %s2823_s15 }
  0x88   :  { %p2830_p4 = por %p2829_p3, %p2828_p2 }
  0x8a   :  { %p2831_p5 = pnand %p2830_p4, %p2824_p1 }
  0x8c   :  { %2834 = shalt.err (!%p2831_p5)
}
  0x8d   :  { %47 = dma.hbm_to_vmem [thread:$0]  %s3503_s24, 256, %s45_s2, [#allocation3]  }
  0x8e   :  { %s3504_s5 = sld [smem:[#allocation38_spill]] }
  0x94   :  { %s2835_s26 = scalar_lea.hbm %s3504_s5, 4096 }
  0x95   :  { %p2836_p6 = scmp.ne.s32.totalorder %s3504_s5, %s2835_s26  ;;  %p2839_p7 = scmp.lt.u32.totalorder %s2835_s26, %s3504_s5 }
  0x97   :  { %p2841_p8 = pnand %p2839_p7, %p2836_p6 }
  0x99   :  { %2844 = shalt.err (!%p2841_p8)
}
  0x9a   :  { %s2845_s30 = scalar_lea.vmem %s68_s1, 4096  ;;  %p2850_p10 = scmp.lt.s32.totalorder %s68_s1, %s68_s1 }
  0x9b   :  { %p2846_p9 = scmp.ne.s32.totalorder %s68_s1, %s2845_s30  ;;  %p2851_p11 = scmp.lt.s32.totalorder %s2845_s30, %s2845_s30 }
  0x9d   :  { %p2852_p12 = por %p2851_p11, %p2850_p10 }
  0x9f   :  { %p2853_p13 = pnand %p2852_p12, %p2846_p9 }
  0xa1   :  { %2856 = shalt.err (!%p2853_p13)
}
  0xa2   :  { %73 = dma.hbm_to_vmem [thread:$0]  %s3504_s5, 4096, %s68_s1, [#allocation6], %s3052_s28, %s3052_s28, %s3053_s29  }
  0xa3   :  { %s3060_s3 = smov [#allocation10]   ;;  %s3505_s23 = sld [smem:[#allocation40_spill]] }
  0xa4   :  { %s89_s0 = sshll.u32 %s3060_s3, 4  ;;  %s90_s0 = int_to_ptr.vmem [resolvable:$true] %s89_s0 }
  0xa9   :  { %s2857_s20 = scalar_lea.hbm %s3505_s23, 2048 }
  0xaa   :  { %p2858_p0 = scmp.ne.s32.totalorder %s3505_s23, %s2857_s20  ;;  %p2861_p1 = scmp.lt.u32.totalorder %s2857_s20, %s3505_s23 }
  0xac   :  { %p2863_p2 = pnand %p2861_p1, %p2858_p0 }
  0xae   :  { %2866 = shalt.err (!%p2863_p2)
}
  0xaf   :  { %s2867_s4 = scalar_lea.vmem %s90_s0, 2048  ;;  %p2872_p4 = scmp.lt.s32.totalorder %s90_s0, %s90_s0 }
  0xb0   :  { %p2868_p3 = scmp.ne.s32.totalorder %s90_s0, %s2867_s4  ;;  %p2873_p5 = scmp.lt.s32.totalorder %s2867_s4, %s2867_s4 }
  0xb2   :  { %p2874_p6 = por %p2873_p5, %p2872_p4 }
  0xb4   :  { %p2875_p7 = pnand %p2874_p6, %p2868_p3 }
  0xb6   :  { %2878 = shalt.err (!%p2875_p7)
}
  0xb7   :  { %s3061_s1 = smov 64   ;;  %s3062_s5 = smov 4  }
  0xb8   :  { %95 = dma.hbm_to_vmem [thread:$0]  %s3505_s23, 2048, %s90_s0, [#allocation9], %s3061_s1, %s3061_s1, %s3062_s5  }
  0xb9   :  { %s3063_s30 = smov [#allocation13]   ;;  %s3064_s24 = smov [#allocation16]  }
  0xba   :  { %s113_s2 = sshll.u32 %s3063_s30, 4  ;;  %s141_s3 = sshll.u32 %s3064_s24, 4  ;;  %s114_s2 = int_to_ptr.vmem [resolvable:$true] %s113_s2  ;;  %s3302_s3 = int_to_ptr.vmem [resolvable:$true] %s141_s3 }
  0xbb   :  { %s2879_s20 = scalar_lea.hbm %s3465_s8, 2048 }
  0xbc   :  { %p2880_p8 = scmp.ne.s32.totalorder %s3465_s8, %s2879_s20  ;;  %p2883_p9 = scmp.lt.u32.totalorder %s2879_s20, %s3465_s8 }
  0xbe   :  { %p2885_p10 = pnand %p2883_p9, %p2880_p8 }
  0xc0   :  { %2888 = shalt.err (!%p2885_p10)
}
  0xc1   :  { %s2889_s0 = scalar_lea.vmem %s114_s2, 2048  ;;  %p2894_p12 = scmp.lt.s32.totalorder %s114_s2, %s114_s2 }
  0xc2   :  { %p2890_p11 = scmp.ne.s32.totalorder %s114_s2, %s2889_s0  ;;  %p2895_p13 = scmp.lt.s32.totalorder %s2889_s0, %s2889_s0 }
  0xc4   :  { %p2896_p0 = por %p2895_p13, %p2894_p12 }
  0xc6   :  { %p2897_p1 = pnand %p2896_p0, %p2890_p11 }
  0xc8   :  { %2900 = shalt.err (!%p2897_p1)
}
  0xc9   :  { %119 = dma.hbm_to_vmem [thread:$0]  %s3465_s8, 2048, %s114_s2, [#allocation12], %s3052_s28, %s3052_s28, %s3053_s29  }
  0xca   :  { %s2901_s30 = scalar_lea.hbm %s3469_s12, 2048 }
  0xcb   :  { %p2902_p2 = scmp.ne.s32.totalorder %s3469_s12, %s2901_s30  ;;  %p2905_p3 = scmp.lt.u32.totalorder %s2901_s30, %s3469_s12 }
  0xcd   :  { %p2907_p4 = pnand %p2905_p3, %p2902_p2 }
  0xcf   :  { %2910 = shalt.err (!%p2907_p4)
}
  0xd0   :  { %s2911_s21 = scalar_lea.vmem %s3302_s3, 2048  ;;  %p2916_p6 = scmp.lt.s32.totalorder %s3302_s3, %s3302_s3 }
  0xd1   :  { %p2912_p5 = scmp.ne.s32.totalorder %s3302_s3, %s2911_s21  ;;  %p2917_p7 = scmp.lt.s32.totalorder %s2911_s21, %s2911_s21 }
  0xd3   :  { %p2918_p8 = por %p2917_p7, %p2916_p6 }
  0xd5   :  { %p2919_p9 = pnand %p2918_p8, %p2912_p5 }
  0xd7   :  { %2922 = shalt.err (!%p2919_p9)
}
  0xd8   :  { %147 = dma.hbm_to_vmem [thread:$0]  %s3469_s12, 2048, %s3302_s3, [#allocation15], %s3061_s1, %s3061_s1, %s3062_s5  }
  0xd9   :  { %s3065_s10 = smov [#allocation19]   ;;  %s3066_s27 = smov [#allocation20]  }
  0xda   :  { %s171_s26 = sshll.u32 %s3065_s10, 4  ;;  %s185_s0 = sshll.u32 %s3066_s27, 4  ;;  %s172_s26 = int_to_ptr.vmem [resolvable:$true] %s171_s26  ;;  %s3339_s0 = int_to_ptr.vmem [resolvable:$true] %s185_s0 }
  0xdb   :  { %s2923_s7 = scalar_lea.hbm %s3474_s17, 4096 }
  0xdc   :  { %p2924_p10 = scmp.ne.s32.totalorder %s3474_s17, %s2923_s7  ;;  %p2927_p11 = scmp.lt.u32.totalorder %s2923_s7, %s3474_s17 }
  0xde   :  { %p2929_p12 = pnand %p2927_p11, %p2924_p10 }
  0xe0   :  { %2932 = shalt.err (!%p2929_p12)
}
  0xe1   :  { %s2933_s12 = scalar_lea.vmem %s172_s26, 4096  ;;  %p2938_p0 = scmp.lt.s32.totalorder %s172_s26, %s172_s26 }
  0xe2   :  { %p2934_p13 = scmp.ne.s32.totalorder %s172_s26, %s2933_s12  ;;  %p2939_p1 = scmp.lt.s32.totalorder %s2933_s12, %s2933_s12 }
  0xe4   :  { %p2940_p2 = por %p2939_p1, %p2938_p0 }
  0xe6   :  { %p2941_p3 = pnand %p2940_p2, %p2934_p13 }
  0xe8   :  { %2944 = shalt.err (!%p2941_p3)
}
  0xe9   :  { %177 = dma.hbm_to_vmem [thread:$0]  %s3474_s17, 4096, %s172_s26, [#allocation18], %s3052_s28, %s3052_s28, %s3053_s29  }
  0xea   :  { %s2945_s8 = scalar_lea.hbm %s3476_s19, 2048 }
  0xeb   :  { %p2946_p4 = scmp.ne.s32.totalorder %s3476_s19, %s2945_s8  ;;  %p2949_p5 = scmp.lt.u32.totalorder %s2945_s8, %s3476_s19 }
  0xed   :  { %p2951_p6 = pnand %p2949_p5, %p2946_p4 }
  0xef   :  { %2954 = shalt.err (!%p2951_p6)
}
  0xf0   :  { %s2955_s4 = scalar_lea.vmem %s3339_s0, 2048  ;;  %p2960_p8 = scmp.lt.s32.totalorder %s3339_s0, %s3339_s0 }
  0xf1   :  { %p2956_p7 = scmp.ne.s32.totalorder %s3339_s0, %s2955_s4  ;;  %p2961_p9 = scmp.lt.s32.totalorder %s2955_s4, %s2955_s4 }
  0xf3   :  { %p2962_p10 = por %p2961_p9, %p2960_p8 }
  0xf5   :  { %p2963_p11 = pnand %p2962_p10, %p2956_p7 }
  0xf7   :  { %2966 = shalt.err (!%p2963_p11)
}
  0xf8   :  { %191 = dma.hbm_to_vmem [thread:$0]  %s3476_s19, 2048, %s3339_s0, [#allocation21], %s3061_s1, %s3061_s1, %s3062_s5  }
  0xf9   :  { %3033 = dma.done.wait [#allocation3], 256  }
  0xfa   :  { %3034 = vsyncadd [#allocation3], 4294967040 }
  0xfb   :  { %3035 = dma.done.wait [#allocation6], 8192  }
  0xfc   :  { %3036 = vsyncadd [#allocation6], 4294959104 }
  0xfd   :  { %3037 = dma.done.wait [#allocation9], 2080  }
  0xfe   :  { %3038 = vsyncadd [#allocation9], 4294965216 }
  0xff   :  { %3039 = dma.done.wait [#allocation12], 2064  }
 0x100   :  { %3040 = vsyncadd [#allocation12], 4294965232 }
 0x101   :  { %3041 = dma.done.wait [#allocation15], 6144  }
 0x102   :  { %3042 = vsyncadd [#allocation15], 4294961152 }
 0x103   :  { %3043 = dma.done.wait [#allocation18], 6144  }
 0x104   :  { %3044 = vsyncadd [#allocation18], 4294961152 }
 0x105   :  { %3045 = dma.done.wait [#allocation21], 2048  }
 0x106   :  { %3046 = vsyncadd [#allocation21], 4294965248  ;;  %v2415_v0 = vld [vmem:[#allocation5 + $0x4] ss:$8 sps:$4 sm:$0xff]   ;;  %v2417_v1 = vld [vmem:[#allocation5] ss:$8 sps:$4 sm:$0xff]  }
 0x107   :  { %439 = vmatprep.subr.bf16.mxu0 %v2415_v0  ;;  %v2418_v2 = vld [vmem:[#allocation5 + $0x14] ss:$8 sps:$4 sm:$0xff]   ;;  %v2420_v3 = vld [vmem:[#allocation5 + $0x10] ss:$8 sps:$4 sm:$0xff]   ;;  %v2421_v4 = vld [vmem:[#allocation5 + $0x24] ss:$8 sps:$4 sm:$0xff]  }
 0x108   :  { %440 = vmatpush1.bf16.msra.mxu0 %v2417_v1  ;;  %v2423_v5 = vld [vmem:[#allocation5 + $0x20] ss:$8 sps:$4 sm:$0xff]   ;;  %v2424_v6 = vld [vmem:[#allocation5 + $0x34] ss:$8 sps:$4 sm:$0xff]   ;;  %v2426_v7 = vld [vmem:[#allocation5 + $0x30] ss:$8 sps:$4 sm:$0xff]  }
 0x109   :  { %441 = vmatprep.subr.bf16.mxu0 %v2418_v2  ;;  %v2427_v8 = vld [vmem:[#allocation5 + $0x44] ss:$8 sps:$4 sm:$0xff]   ;;  %v2429_v9 = vld [vmem:[#allocation5 + $0x40] ss:$8 sps:$4 sm:$0xff]   ;;  %v2430_v10 = vld [vmem:[#allocation5 + $0x54] ss:$8 sps:$4 sm:$0xff]  }
 0x10a   :  { %v2432_v11 = vld [vmem:[#allocation5 + $0x50] ss:$8 sps:$4 sm:$0xff]   ;;  %v2433_v12 = vld [vmem:[#allocation5 + $0x64] ss:$8 sps:$4 sm:$0xff]   ;;  %v2435_v13 = vld [vmem:[#allocation5 + $0x60] ss:$8 sps:$4 sm:$0xff]  }
 0x10b   :  { %v232_v14 = vld [vmem:[#allocation2 + $0x8] sm:$0xff]  ;;  %v2463_v16 = vld [vmem:[#allocation7 + $0x4] ss:$8 sps:$4 sm:$0xff]   ;;  %v2465_v17 = vld [vmem:[#allocation7] ss:$8 sps:$4 sm:$0xff]   ;;  %s3506_s1 = sld [smem:[#allocation37_spill]] }
 0x10c   :  { %442 = vmatpush1.bf16.msra.mxu0 %v2420_v3  ;;  %v234_v15 = vpack.c.bf16 %v232_v14, %v232_v14  ;;  %v2436_v18 = vld [vmem:[#allocation5 + $0x74] ss:$8 sps:$4 sm:$0xff]   ;;  %v2438_v20 = vld [vmem:[#allocation5 + $0x70] ss:$8 sps:$4 sm:$0xff]   ;;  %688 = vmatprep.subr.bf16.mxu1 %v2463_v16  ;;  %v2469_v22 = vld [vmem:[#allocation7 + $0x24] ss:$8 sps:$4 sm:$0xff]  }
 0x10d   :  { %443 = vmatprep.subr.bf16.mxu0 %v2421_v4  ;;  %v2466_v19 = vld [vmem:[#allocation7 + $0x14] ss:$8 sps:$4 sm:$0xff]   ;;  %689 = vmatpush1.bf16.msra.mxu1 %v2465_v17  ;;  %v2468_v21 = vld [vmem:[#allocation7 + $0x10] ss:$8 sps:$4 sm:$0xff]   ;;  %v2439_v23 = vld [vmem:[#allocation5 + $0x84] ss:$8 sps:$4 sm:$0xff]   ;;  %v269_v17 = vlaneseq }
 0x10e   :  { %471 = vmatprep.mubr.bf16.mxu0 %v234_v15  ;;  %690 = vmatprep.subr.bf16.mxu1 %v2466_v19  ;;  %v2441_v24 = vld [vmem:[#allocation5 + $0x80] ss:$8 sps:$4 sm:$0xff]   ;;  %v2472_v26 = vld [vmem:[#allocation7 + $0x34] ss:$8 sps:$4 sm:$0xff]   ;;  %v2444_v28 = vld [vmem:[#allocation5 + $0x90] ss:$8 sps:$4 sm:$0xff]  }
 0x10f   :  { %v2471_v25 = vld [vmem:[#allocation7 + $0x20] ss:$8 sps:$4 sm:$0xff]   ;;  %v2442_v27 = vld [vmem:[#allocation5 + $0x94] ss:$8 sps:$4 sm:$0xff]   ;;  %v2474_v29 = vld [vmem:[#allocation7 + $0x30] ss:$8 sps:$4 sm:$0xff]  }
 0x110   :  { %444 = vmatpush1.bf16.msra.mxu0 %v2423_v5  ;;  %v2475_v30 = vld [vmem:[#allocation7 + $0x44] ss:$8 sps:$4 sm:$0xff]   ;;  %v2447_v32 = vld [vmem:[#allocation5 + $0xa0] ss:$8 sps:$4 sm:$0xff]   ;;  %v2478_v34 = vld [vmem:[#allocation7 + $0x54] ss:$8 sps:$4 sm:$0xff]  }
 0x111   :  { %445 = vmatprep.subr.bf16.mxu0 %v2424_v6  ;;  %691 = vmatpush1.bf16.msra.mxu1 %v2468_v21  ;;  %v2445_v31 = vld [vmem:[#allocation5 + $0xa4] ss:$8 sps:$4 sm:$0xff]   ;;  %v2477_v33 = vld [vmem:[#allocation7 + $0x40] ss:$8 sps:$4 sm:$0xff]   ;;  %v2448_v35 = vld [vmem:[#allocation5 + $0xb4] ss:$8 sps:$4 sm:$0xff]  }
 0x112   :  { %692 = vmatprep.subr.bf16.mxu1 %v2469_v22  ;;  %v2480_v36 = vld [vmem:[#allocation7 + $0x50] ss:$8 sps:$4 sm:$0xff]   ;;  %v2481_v38 = vld [vmem:[#allocation7 + $0x64] ss:$8 sps:$4 sm:$0xff]   ;;  %v2483_v40 = vld [vmem:[#allocation7 + $0x60] ss:$8 sps:$4 sm:$0xff]  }
 0x113   :  { %v2450_v37 = vld [vmem:[#allocation5 + $0xb0] ss:$8 sps:$4 sm:$0xff]   ;;  %v2451_v39 = vld [vmem:[#allocation5 + $0xc4] ss:$8 sps:$4 sm:$0xff]   ;;  %v2453_v41 = vld [vmem:[#allocation5 + $0xc0] ss:$8 sps:$4 sm:$0xff]  }
 0x114   :  { %446 = vmatpush1.bf16.msra.mxu0 %v2426_v7  ;;  %v2484_v42 = vld [vmem:[#allocation7 + $0x74] ss:$8 sps:$4 sm:$0xff]   ;;  %v2486_v44 = vld [vmem:[#allocation7 + $0x70] ss:$8 sps:$4 sm:$0xff]   ;;  %v2487_v46 = vld [vmem:[#allocation7 + $0x84] ss:$8 sps:$4 sm:$0xff]  }
 0x115   :  { %447 = vmatprep.subr.bf16.mxu0 %v2427_v8  ;;  %693 = vmatpush1.bf16.msra.mxu1 %v2471_v25  ;;  %v2454_v43 = vld [vmem:[#allocation5 + $0xd4] ss:$8 sps:$4 sm:$0xff]   ;;  %v2456_v45 = vld [vmem:[#allocation5 + $0xd0] ss:$8 sps:$4 sm:$0xff]   ;;  %v2457_v47 = vld [vmem:[#allocation5 + $0xe4] ss:$8 sps:$4 sm:$0xff]  }
 0x116   :  { %694 = vmatprep.subr.bf16.mxu1 %v2472_v26  ;;  %v2489_v48 = vld [vmem:[#allocation7 + $0x80] ss:$8 sps:$4 sm:$0xff]   ;;  %v2490_v50 = vld [vmem:[#allocation7 + $0x94] ss:$8 sps:$4 sm:$0xff]   ;;  %v2492_v52 = vld [vmem:[#allocation7 + $0x90] ss:$8 sps:$4 sm:$0xff]  }
 0x117   :  { %v2459_v49 = vld [vmem:[#allocation5 + $0xe0] ss:$8 sps:$4 sm:$0xff]   ;;  %v2460_v51 = vld [vmem:[#allocation5 + $0xf4] ss:$8 sps:$4 sm:$0xff]   ;;  %v2462_v53 = vld [vmem:[#allocation5 + $0xf0] ss:$8 sps:$4 sm:$0xff]  }
 0x118   :  { %448 = vmatpush1.bf16.msra.mxu0 %v2429_v9  ;;  %v231_v54 = vld [vmem:[#allocation2] sm:$0xff]  ;;  %v2493_v55 = vld [vmem:[#allocation7 + $0xa4] ss:$8 sps:$4 sm:$0xff]   ;;  %v2495_v56 = vld [vmem:[#allocation7 + $0xa0] ss:$8 sps:$4 sm:$0xff]   ;;  %s3507_s0 = sld [smem:[#allocation42_spill]] }
 0x119   :  { %449 = vmatprep.subr.bf16.mxu0 %v2430_v10  ;;  %695 = vmatpush1.bf16.msra.mxu1 %v2474_v29  ;;  %v2496_v57 = vld [vmem:[#allocation7 + $0xb4] ss:$8 sps:$4 sm:$0xff]   ;;  %v233_v58 = vpack.c.bf16 %v231_v54, %v231_v54  ;;  %v2498_v59 = vld [vmem:[#allocation7 + $0xb0] ss:$8 sps:$4 sm:$0xff]   ;;  %v2499_v60 = vld [vmem:[#allocation7 + $0xc4] ss:$8 sps:$4 sm:$0xff]  }
 0x11a   :  { %696 = vmatprep.subr.bf16.mxu1 %v2475_v30  ;;  %v2501_v61 = vld [vmem:[#allocation7 + $0xc0] ss:$8 sps:$4 sm:$0xff]   ;;  %v2502_v62 = vld [vmem:[#allocation7 + $0xd4] ss:$8 sps:$4 sm:$0xff]   ;;  %v2504_v63 = vld [vmem:[#allocation7 + $0xd0] ss:$8 sps:$4 sm:$0xff]  }
 0x11b   :  { %v2505_v0 = vld [vmem:[#allocation7 + $0xe4] ss:$8 sps:$4 sm:$0xff]   ;;  %v2507_v1 = vld [vmem:[#allocation7 + $0xe0] ss:$8 sps:$4 sm:$0xff]   ;;  %v2508_v2 = vld [vmem:[#allocation7 + $0xf4] ss:$8 sps:$4 sm:$0xff]  }
 0x11c   :  { %450 = vmatpush1.bf16.msra.mxu0 %v2432_v11  ;;  %v2510_v3 = vld [vmem:[#allocation7 + $0xf0] ss:$8 sps:$4 sm:$0xff]   ;;  %v2535_v5 = vld [vmem:[#allocation10 + $0x40] sm:$0xff]   ;;  %s3068_s15 = smov [#allocation23]  }
 0x11d   :  { %451 = vmatprep.subr.bf16.mxu0 %v2433_v12  ;;  %697 = vmatpush1.bf16.msra.mxu1 %v2477_v33  ;;  %v2513_v4 = vld [vmem:[#allocation13 + $0x4] ss:$8 sps:$4 sm:$0xff]   ;;  %v2541_v11 = vld [vmem:[#allocation10 + $0x58] sm:$0xff]   ;;  %v2511_v33 = vld [vmem:[#allocation13] ss:$8 sps:$4 sm:$0xff]   ;;  %s2086_s20 = sshll.u32 %s3068_s15, 4  ;;  %s2087_s20 = int_to_ptr.vmem [resolvable:$true] %s2086_s20 }
 0x11e   :  { %698 = vmatprep.subr.bf16.mxu1 %v2478_v34  ;;  %v2536_v6 = vld [vmem:[#allocation10] sm:$0xff]   ;;  %v2537_v7 = vld [vmem:[#allocation10 + $0x48] sm:$0xff]   ;;  %v2539_v9 = vld [vmem:[#allocation10 + $0x50] sm:$0xff]   ;;  %s2967_s8 = scalar_lea.vmem %s2087_s20, 128  ;;  %p2972_p13 = scmp.lt.s32.totalorder %s2087_s20, %s2087_s20 }
 0x11f   :  { %v2538_v8 = vld [vmem:[#allocation10 + $0x8] sm:$0xff]   ;;  %v2540_v10 = vld [vmem:[#allocation10 + $0x10] sm:$0xff]   ;;  %v2542_v12 = vld [vmem:[#allocation10 + $0x18] sm:$0xff]   ;;  %p2968_p12 = scmp.ne.s32.totalorder %s2087_s20, %s2967_s8  ;;  %p2973_p0 = scmp.lt.s32.totalorder %s2967_s8, %s2967_s8 }
 0x120   :  { %452 = vmatpush1.bf16.msra.mxu0 %v2435_v13  ;;  %v2543_v13 = vld [vmem:[#allocation10 + $0x60] sm:$0xff]   ;;  %v2545_v15 = vld [vmem:[#allocation10 + $0x68] sm:$0xff]   ;;  %v2549_v54 = vld [vmem:[#allocation10 + $0x78] sm:$0xff]  }
 0x121   :  { %453 = vmatprep.subr.bf16.mxu0 %v2436_v18  ;;  %699 = vmatpush1.bf16.msra.mxu1 %v2480_v36  ;;  %v2544_v14 = vld [vmem:[#allocation10 + $0x20] sm:$0xff]   ;;  %v2546_v16 = vld [vmem:[#allocation10 + $0x28] sm:$0xff]   ;;  %v270_v18 = vshrl.u32 %v269_v17, 7  ;;  %v2514_v36 = vld [vmem:[#allocation13 + $0x10] ss:$8 sps:$4 sm:$0xff]   ;;  %p2974_p1 = por %p2973_p0, %p2972_p13 }
 0x122   :  { %700 = vmatprep.subr.bf16.mxu1 %v2481_v38  ;;  %v2519_v38 = vld [vmem:[#allocation13 + $0x24] ss:$8 sps:$4 sm:$0xff]  }
 0x123   :  { %v3376_v19 = vsub.s32 0, %v270_v18  ;;  %v3381_v21 = vsub.s32 1, %v270_v18  ;;  %v2571_v17 = vld [vmem:[#allocation14 + $0x64] ss:$8 sps:$4 sm:$0xff]   ;;  %p2975_p2 = pnand %p2974_p1, %p2968_p12 }
 0x124   :  { %454 = vmatpush1.bf16.msra.mxu0 %v2438_v20  ;;  %v267_v20 = vld [vmem:[%s3506_s1] sm:$0x3] }
 0x125   :  { %455 = vmatprep.subr.bf16.mxu0 %v2439_v23  ;;  %701 = vmatpush1.bf16.msra.mxu1 %v2483_v40  ;;  %v272_v22 = vrot.slane %v267_v20, %v3376_v19  ;;  %v276_v23 = vrot.slane %v267_v20, %v3381_v21  ;;  %v2522_v40 = vld [vmem:[#allocation13 + $0x34] ss:$8 sps:$4 sm:$0xff]   ;;  %v927_v18 = vld [vmem:[%s3466_s9] sm:$0x3]  ;;  %v2569_v20 = vld [vmem:[#allocation14 + $0x60] ss:$8 sps:$4 sm:$0xff]  }
 0x126   :  { %702 = vmatprep.subr.bf16.mxu1 %v2484_v42  ;;  %v2525_v42 = vld [vmem:[#allocation13 + $0x44] ss:$8 sps:$4 sm:$0xff]  }
 0x128   :  { %456 = vmatpush1.bf16.msra.mxu0 %v2441_v24 }
 0x129   :  { %457 = vmatprep.subr.bf16.mxu0 %v2442_v27  ;;  %703 = vmatpush1.bf16.msra.mxu1 %v2486_v44  ;;  %v2528_v44 = vld [vmem:[#allocation13 + $0x54] ss:$8 sps:$4 sm:$0xff]  }
 0x12a   :  { %704 = vmatprep.subr.bf16.mxu1 %v2487_v46  ;;  %v2531_v46 = vld [vmem:[#allocation13 + $0x64] ss:$8 sps:$4 sm:$0xff]  }
 0x12c   :  { %458 = vmatpush1.bf16.msra.mxu0 %v2444_v28 }
 0x12d   :  { %459 = vmatprep.subr.bf16.mxu0 %v2445_v31  ;;  %705 = vmatpush1.bf16.msra.mxu1 %v2489_v48  ;;  %v2534_v48 = vld [vmem:[#allocation13 + $0x74] ss:$8 sps:$4 sm:$0xff]  }
 0x12e   :  { %706 = vmatprep.subr.bf16.mxu1 %v2490_v50  ;;  %v909_v50 = vld [vmem:[%s3507_s0] sm:$0xff] }
 0x130   :  { %460 = vmatpush1.bf16.msra.mxu0 %v2447_v32 }
 0x131   :  { %461 = vmatprep.subr.bf16.mxu0 %v2448_v35  ;;  %707 = vmatpush1.bf16.msra.mxu1 %v2492_v52  ;;  %v2516_v35 = vld [vmem:[#allocation13 + $0x14] ss:$8 sps:$4 sm:$0xff]  }
 0x132   :  { %708 = vmatprep.subr.bf16.mxu1 %v2493_v55  ;;  %v2547_v52 = vld [vmem:[#allocation10 + $0x70] sm:$0xff]   ;;  %v2550_v55 = vld [vmem:[#allocation10 + $0x38] sm:$0xff]  }
 0x134   :  { %462 = vmatpush1.bf16.msra.mxu0 %v2450_v37  ;;  %v3067_v37 = vmov 0  }
 0x135   :  { %463 = vmatprep.subr.bf16.mxu0 %v2451_v39  ;;  %709 = vmatpush1.bf16.msra.mxu1 %v2495_v56  ;;  %v2517_v39 = vld [vmem:[#allocation13 + $0x20] ss:$8 sps:$4 sm:$0xff]   ;;  %v2553_v56 = vld [vmem:[#allocation14 + $0x4] ss:$8 sps:$4 sm:$0xff]  }
 0x136   :  { %710 = vmatprep.subr.bf16.mxu1 %v2496_v57  ;;  %v516_v57 = vld [vmem:[#allocation8] sm:$0x3] }
 0x138   :  { %464 = vmatpush1.bf16.msra.mxu0 %v2453_v41  ;;  %v2520_v41 = vld [vmem:[#allocation13 + $0x30] ss:$8 sps:$4 sm:$0xff]  }
 0x139   :  { %465 = vmatprep.subr.bf16.mxu0 %v2454_v43  ;;  %711 = vmatpush1.bf16.msra.mxu1 %v2498_v59  ;;  %v2523_v43 = vld [vmem:[#allocation13 + $0x40] ss:$8 sps:$4 sm:$0xff]   ;;  %v525_v59 = vrot.slane %v516_v57, %v3381_v21 }
 0x13a   :  { %712 = vmatprep.subr.bf16.mxu1 %v2499_v60 }
 0x13c   :  { %466 = vmatpush1.bf16.msra.mxu0 %v2456_v45  ;;  %v2526_v45 = vld [vmem:[#allocation13 + $0x50] ss:$8 sps:$4 sm:$0xff]  }
 0x13d   :  { %467 = vmatprep.subr.bf16.mxu0 %v2457_v47  ;;  %713 = vmatpush1.bf16.msra.mxu1 %v2501_v61  ;;  %v2529_v47 = vld [vmem:[#allocation13 + $0x60] ss:$8 sps:$4 sm:$0xff]  }
 0x13e   :  { %714 = vmatprep.subr.bf16.mxu1 %v2502_v62 }
 0x140   :  { %468 = vmatpush1.bf16.msra.mxu0 %v2459_v49  ;;  %v2532_v49 = vld [vmem:[#allocation13 + $0x70] ss:$8 sps:$4 sm:$0xff]  }
 0x141   :  { %469 = vmatprep.subr.bf16.mxu0 %v2460_v51  ;;  %715 = vmatpush1.bf16.msra.mxu1 %v2504_v63  ;;  %v910_v51 = vpack.c.bf16 %v909_v50, %v909_v50  ;;  %v2596_v50 = vld [vmem:[#allocation14 + $0xf0] ss:$8 sps:$4 sm:$0xff]  }
 0x142   :  { %716 = vmatprep.subr.bf16.mxu1 %v2505_v0 }
 0x144   :  { %470 = vmatpush1.bf16.msra.mxu0 %v2462_v53  ;;  %v2548_v53 = vld [vmem:[#allocation10 + $0x30] sm:$0xff]  }
 0x145   :  { %717 = vmatpush1.bf16.msra.mxu1 %v2507_v1  ;;  %2329 = vmatprep.subr.bf16.mxu0 %v2535_v5  ;;  %v2551_v5 = vld [vmem:[#allocation14] ss:$8 sps:$4 sm:$0xff]  }
 0x146   :  { %718 = vmatprep.subr.bf16.mxu1 %v2508_v2 }
 0x147   :  { %472 = vmatmul.mubr.bf16.vlgmr.msra.gmra.mrb[0].mxu0 %v233_v58  ;;  %v521_v58 = vrot.slane %v516_v57, %v3376_v19  ;;  %v2603_v57 = vld [vmem:[#allocation16 + $0x50] sm:$0xff]  }
 0x148   :  { %2330 = vmatpush3.bf16.msra.mxu0 %v2536_v6 }
 0x149   :  { %719 = vmatpush1.bf16.msra.mxu1 %v2510_v3  ;;  %2331 = vmatprep.subr.bf16.mxu0 %v2537_v7  ;;  %v2556_v7 = vld [vmem:[#allocation14 + $0x14] ss:$8 sps:$4 sm:$0xff]  }
 0x14a   :  { %1019 = vmatprep.subr.bf16.mxu1 %v2513_v4 }
 0x14c   :  { %2332 = vmatpush3.bf16.msra.mxu0 %v2538_v8  ;;  %v2554_v8 = vld [vmem:[#allocation14 + $0x10] ss:$8 sps:$4 sm:$0xff]  }
 0x14d   :  { %2333 = vmatprep.subr.bf16.mxu0 %v2539_v9  ;;  %v2559_v9 = vld [vmem:[#allocation14 + $0x24] ss:$8 sps:$4 sm:$0xff]  }
 0x150   :  { %2334 = vmatpush3.bf16.msra.mxu0 %v2540_v10  ;;  %v2557_v10 = vld [vmem:[#allocation14 + $0x20] ss:$8 sps:$4 sm:$0xff]  }
 0x151   :  { %2335 = vmatprep.subr.bf16.mxu0 %v2541_v11  ;;  %v2562_v11 = vld [vmem:[#allocation14 + $0x34] ss:$8 sps:$4 sm:$0xff]  }
 0x154   :  { %2336 = vmatpush3.bf16.msra.mxu0 %v2542_v12  ;;  %v2560_v12 = vld [vmem:[#allocation14 + $0x30] ss:$8 sps:$4 sm:$0xff]  }
 0x155   :  { %2337 = vmatprep.subr.bf16.mxu0 %v2543_v13  ;;  %v2565_v13 = vld [vmem:[#allocation14 + $0x44] ss:$8 sps:$4 sm:$0xff]  }
 0x158   :  { %2338 = vmatpush3.bf16.msra.mxu0 %v2544_v14  ;;  %v2563_v14 = vld [vmem:[#allocation14 + $0x40] ss:$8 sps:$4 sm:$0xff]  }
 0x159   :  { %2339 = vmatprep.subr.bf16.mxu0 %v2545_v15  ;;  %v2568_v15 = vld [vmem:[#allocation14 + $0x54] ss:$8 sps:$4 sm:$0xff]  }
 0x15c   :  { %2340 = vmatpush3.bf16.msra.mxu0 %v2546_v16  ;;  %v2566_v16 = vld [vmem:[#allocation14 + $0x50] ss:$8 sps:$4 sm:$0xff]  }
 0x15d   :  { %2341 = vmatprep.subr.bf16.mxu0 %v2547_v52 }
 0x160   :  { %2342 = vmatpush3.bf16.msra.mxu0 %v2548_v53  ;;  %v2599_v53 = vld [vmem:[#allocation16 + $0x40] sm:$0xff]  }
 0x161   :  { %2343 = vmatprep.subr.bf16.mxu0 %v2549_v54  ;;  %v2600_v54 = vld [vmem:[#allocation16] sm:$0xff]  }
 0x164   :  { %2344 = vmatpush3.bf16.msra.mxu0 %v2550_v55  ;;  %v2601_v55 = vld [vmem:[#allocation16 + $0x48] sm:$0xff]  }
 0x165   :  { %1268 = vmatprep.subr.bf16.mxu0 %v2553_v56  ;;  %v2602_v56 = vld [vmem:[#allocation16 + $0x8] sm:$0xff]  }
 0x21a   :  { %v473_v24 = vpop.f32.mrb[0].mxu0 }
 0x21b   :  { %v474_v25 = vadd.f32 %v473_v24, %v272_v22  ;;  %v475_v26 = vpop.f32.mrb[1].mxu0  ;;  %v936_v22 = vrot.slane %v927_v18, %v3381_v21 }
 0x21c   :  { %v476_v27 = vadd.f32 %v475_v26, %v276_v23  ;;  %v477_v28 = vpop.f32.mrb[2].mxu0  ;;  %v2574_v23 = vld [vmem:[#allocation14 + $0x74] ss:$8 sps:$4 sm:$0xff]   ;;  %v2572_v26 = vld [vmem:[#allocation14 + $0x70] ss:$8 sps:$4 sm:$0xff]  }
 0x21d   :  { %v480_v29 = vmax.f32 %v474_v25, 0.0  ;;  %v478_v30 = vpop.f32.mrb[3].mxu0 }
 0x21e   :  { %v481_v31 = vmax.f32 %v476_v27, 0.0 }
 0x21f   :  { %v482_v34 = vpack.c.bf16 %v480_v29, %v480_v29  ;;  %v2577_v29 = vld [vmem:[#allocation14 + $0x84] ss:$8 sps:$4 sm:$0xff]  }
 0x220   :  { %v483_v32 = vpack.c.bf16 %v481_v31, %v481_v31 }
 0x222   :  { %720 = vmatprep.mubr.bf16.mxu1 %v483_v32  ;;  %v2575_v32 = vld [vmem:[#allocation14 + $0x80] ss:$8 sps:$4 sm:$0xff]  }
 0x223   :  { %721 = vmatmul.mubr.bf16.vlgmr.msra.gmra.mrb[0].mxu1 %v482_v34  ;;  %v2580_v34 = vld [vmem:[#allocation14 + $0x94] ss:$8 sps:$4 sm:$0xff]  }
 0x224   :  { %1020 = vmatpush1.bf16.msra.mxu1 %v2511_v33  ;;  %1051 = vmatprep.mubr.bf16.mxu1 %v3067_v37 }
 0x225   :  { %1021 = vmatprep.subr.bf16.mxu1 %v2516_v35  ;;  %v2578_v35 = vld [vmem:[#allocation14 + $0x90] ss:$8 sps:$4 sm:$0xff]  }
 0x228   :  { %1022 = vmatpush1.bf16.msra.mxu1 %v2514_v36  ;;  %v2583_v36 = vld [vmem:[#allocation14 + $0xa4] ss:$8 sps:$4 sm:$0xff]  }
 0x229   :  { %1023 = vmatprep.subr.bf16.mxu1 %v2519_v38  ;;  %v2581_v38 = vld [vmem:[#allocation14 + $0xa0] ss:$8 sps:$4 sm:$0xff]  }
 0x22c   :  { %1024 = vmatpush1.bf16.msra.mxu1 %v2517_v39  ;;  %v2586_v39 = vld [vmem:[#allocation14 + $0xb4] ss:$8 sps:$4 sm:$0xff]  }
 0x22d   :  { %1025 = vmatprep.subr.bf16.mxu1 %v2522_v40  ;;  %v2584_v40 = vld [vmem:[#allocation14 + $0xb0] ss:$8 sps:$4 sm:$0xff]  }
 0x230   :  { %1026 = vmatpush1.bf16.msra.mxu1 %v2520_v41  ;;  %v2589_v41 = vld [vmem:[#allocation14 + $0xc4] ss:$8 sps:$4 sm:$0xff]  }
 0x231   :  { %1027 = vmatprep.subr.bf16.mxu1 %v2525_v42  ;;  %v2587_v42 = vld [vmem:[#allocation14 + $0xc0] ss:$8 sps:$4 sm:$0xff]  }
 0x234   :  { %1028 = vmatpush1.bf16.msra.mxu1 %v2523_v43  ;;  %v2592_v43 = vld [vmem:[#allocation14 + $0xd4] ss:$8 sps:$4 sm:$0xff]  }
 0x235   :  { %1029 = vmatprep.subr.bf16.mxu1 %v2528_v44  ;;  %v2590_v44 = vld [vmem:[#allocation14 + $0xd0] ss:$8 sps:$4 sm:$0xff]  }
 0x238   :  { %1030 = vmatpush1.bf16.msra.mxu1 %v2526_v45  ;;  %v932_v45 = vrot.slane %v927_v18, %v3376_v19 }
 0x239   :  { %1031 = vmatprep.subr.bf16.mxu1 %v2531_v46  ;;  %v2595_v46 = vld [vmem:[#allocation14 + $0xe4] ss:$8 sps:$4 sm:$0xff]  }
 0x23c   :  { %1032 = vmatpush1.bf16.msra.mxu1 %v2529_v47  ;;  %v2593_v47 = vld [vmem:[#allocation14 + $0xe0] ss:$8 sps:$4 sm:$0xff]  }
 0x23d   :  { %1033 = vmatprep.subr.bf16.mxu1 %v2534_v48 }
 0x240   :  { %1034 = vmatpush1.bf16.msra.mxu1 %v2532_v49  ;;  %v2598_v49 = vld [vmem:[#allocation14 + $0xf4] ss:$8 sps:$4 sm:$0xff]  }
 0x241   :  { %2351 = vmatprep.subr.bf16.mxu1 %v2599_v53  ;;  %v2638_v53 = vld [vmem:[#allocation17 + $0x74] ss:$8 sps:$4 sm:$0xff]  }
 0x243   :  { %1052 = vmatmul.mubr.bf16.vlgmr.msra.gmra.mrb[4].mxu1 %v910_v51 }
 0x244   :  { %2352 = vmatpush3.bf16.msra.mxu1 %v2600_v54  ;;  %v2636_v54 = vld [vmem:[#allocation17 + $0x70] ss:$8 sps:$4 sm:$0xff]  }
 0x245   :  { %2353 = vmatprep.subr.bf16.mxu1 %v2601_v55  ;;  %v1489_v55 = vld [vmem:[%s3471_s14] sm:$0xff] }
 0x248   :  { %2354 = vmatpush3.bf16.msra.mxu1 %v2602_v56  ;;  %v1490_v56 = vpack.c.bf16 %v1489_v55, %v1489_v55 }
 0x249   :  { %2355 = vmatprep.subr.bf16.mxu1 %v2603_v57  ;;  %v2659_v57 = vld [vmem:[#allocation19 + $0x64] ss:$8 sps:$4 sm:$0xff]  }
 0x2f6   :  { %v722_v60 = vpop.f32.mrb[0].mxu1 }
 0x2f7   :  { %v723_v61 = vadd.f32 %v722_v60, %v521_v58  ;;  %v724_v62 = vpop.f32.mrb[1].mxu1  ;;  %v2604_v58 = vld [vmem:[#allocation16 + $0x10] sm:$0xff]   ;;  %v2606_v60 = vld [vmem:[#allocation16 + $0x18] sm:$0xff]  }
 0x2f8   :  { %v725_v63 = vadd.f32 %v724_v62, %v525_v59  ;;  %v726_v0 = vpop.f32.mrb[2].mxu1  ;;  %v2605_v59 = vld [vmem:[#allocation16 + $0x58] sm:$0xff]   ;;  %2356 = vmatpush3.bf16.msra.mxu1 %v2604_v58  ;;  %v2608_v62 = vld [vmem:[#allocation16 + $0x20] sm:$0xff]  }
 0x2f9   :  { %v729_v1 = vmax.f32 %v723_v61, 0.0  ;;  %v727_v2 = vpop.f32.mrb[3].mxu1  ;;  %2357 = vmatprep.subr.bf16.mxu1 %v2605_v59  ;;  %v2607_v61 = vld [vmem:[#allocation16 + $0x60] sm:$0xff]   ;;  %v2610_v0 = vld [vmem:[#allocation16 + $0x28] sm:$0xff]   ;;  %v2662_v59 = vld [vmem:[#allocation19 + $0x74] ss:$8 sps:$4 sm:$0xff]  }
 0x2fa   :  { %v730_v3 = vmax.f32 %v725_v63, 0.0  ;;  %v2609_v63 = vld [vmem:[#allocation16 + $0x68] sm:$0xff]   ;;  %v2612_v2 = vld [vmem:[#allocation16 + $0x30] sm:$0xff]  }
 0x2fb   :  { %v731_v6 = vpack.c.bf16 %v729_v1, %v729_v1  ;;  %v2611_v1 = vld [vmem:[#allocation16 + $0x70] sm:$0xff]   ;;  %v2657_v58 = vld [vmem:[#allocation19 + $0x60] ss:$8 sps:$4 sm:$0xff]  }
 0x2fc   :  { %v732_v4 = vpack.c.bf16 %v730_v3, %v730_v3  ;;  %2358 = vmatpush3.bf16.msra.mxu1 %v2606_v60  ;;  %v2613_v3 = vld [vmem:[#allocation16 + $0x78] sm:$0xff]  }
 0x2fd   :  { %2359 = vmatprep.subr.bf16.mxu1 %v2607_v61  ;;  %v2660_v60 = vld [vmem:[#allocation19 + $0x70] ss:$8 sps:$4 sm:$0xff]   ;;  %v2663_v61 = vld [vmem:[#allocation19 + $0x80] ss:$8 sps:$4 sm:$0xff]  }
 0x2fe   :  { %900 = vmatprep.mubr.bf16.mxu0 %v732_v4  ;;  %v2614_v4 = vld [vmem:[#allocation16 + $0x38] sm:$0xff]  }
 0x2ff   :  { %901 = vmatmul.mubr.bf16.vlgmr.msra.gmra.mrb[4].mxu0 %v731_v6  ;;  %v2639_v6 = vld [vmem:[#allocation19] ss:$8 sps:$4 sm:$0xff]  }
 0x300   :  { %1269 = vmatpush1.bf16.msra.mxu0 %v2551_v5  ;;  %2360 = vmatpush3.bf16.msra.mxu1 %v2608_v62  ;;  %v2617_v5 = vld [vmem:[#allocation17 + $0x4] ss:$8 sps:$4 sm:$0xff]  }
 0x301   :  { %1270 = vmatprep.subr.bf16.mxu0 %v2556_v7  ;;  %2361 = vmatprep.subr.bf16.mxu1 %v2609_v63  ;;  %v2641_v7 = vld [vmem:[#allocation19 + $0x4] ss:$8 sps:$4 sm:$0xff]   ;;  %v2668_v63 = vld [vmem:[#allocation19 + $0x94] ss:$8 sps:$4 sm:$0xff]  }
 0x302   :  { %v2665_v62 = vld [vmem:[#allocation19 + $0x84] ss:$8 sps:$4 sm:$0xff]  }
 0x304   :  { %1271 = vmatpush1.bf16.msra.mxu0 %v2554_v8  ;;  %2362 = vmatpush3.bf16.msra.mxu1 %v2610_v0  ;;  %v2644_v8 = vld [vmem:[#allocation19 + $0x14] ss:$8 sps:$4 sm:$0xff]   ;;  %v2666_v0 = vld [vmem:[#allocation19 + $0x90] ss:$8 sps:$4 sm:$0xff]  }
 0x305   :  { %1272 = vmatprep.subr.bf16.mxu0 %v2559_v9  ;;  %2363 = vmatprep.subr.bf16.mxu1 %v2611_v1  ;;  %v2642_v9 = vld [vmem:[#allocation19 + $0x10] ss:$8 sps:$4 sm:$0xff]   ;;  %v2671_v1 = vld [vmem:[#allocation19 + $0xa4] ss:$8 sps:$4 sm:$0xff]  }
 0x308   :  { %1273 = vmatpush1.bf16.msra.mxu0 %v2557_v10  ;;  %2364 = vmatpush3.bf16.msra.mxu1 %v2612_v2  ;;  %v2647_v10 = vld [vmem:[#allocation19 + $0x24] ss:$8 sps:$4 sm:$0xff]   ;;  %v2669_v2 = vld [vmem:[#allocation19 + $0xa0] ss:$8 sps:$4 sm:$0xff]  }
 0x309   :  { %1274 = vmatprep.subr.bf16.mxu0 %v2562_v11  ;;  %2365 = vmatprep.subr.bf16.mxu1 %v2613_v3  ;;  %v2645_v11 = vld [vmem:[#allocation19 + $0x20] ss:$8 sps:$4 sm:$0xff]   ;;  %v2674_v3 = vld [vmem:[#allocation19 + $0xb4] ss:$8 sps:$4 sm:$0xff]  }
 0x30c   :  { %1275 = vmatpush1.bf16.msra.mxu0 %v2560_v12  ;;  %2366 = vmatpush3.bf16.msra.mxu1 %v2614_v4  ;;  %v2650_v12 = vld [vmem:[#allocation19 + $0x34] ss:$8 sps:$4 sm:$0xff]   ;;  %v2672_v4 = vld [vmem:[#allocation19 + $0xb0] ss:$8 sps:$4 sm:$0xff]  }
 0x30d   :  { %1276 = vmatprep.subr.bf16.mxu0 %v2565_v13  ;;  %1599 = vmatprep.subr.bf16.mxu1 %v2617_v5  ;;  %v2648_v13 = vld [vmem:[#allocation19 + $0x30] ss:$8 sps:$4 sm:$0xff]   ;;  %v2677_v5 = vld [vmem:[#allocation19 + $0xc4] ss:$8 sps:$4 sm:$0xff]  }
 0x310   :  { %1277 = vmatpush1.bf16.msra.mxu0 %v2563_v14  ;;  %v2653_v14 = vld [vmem:[#allocation19 + $0x44] ss:$8 sps:$4 sm:$0xff]  }
 0x311   :  { %1278 = vmatprep.subr.bf16.mxu0 %v2568_v15  ;;  %v2651_v15 = vld [vmem:[#allocation19 + $0x40] ss:$8 sps:$4 sm:$0xff]  }
 0x314   :  { %1279 = vmatpush1.bf16.msra.mxu0 %v2566_v16  ;;  %v2656_v16 = vld [vmem:[#allocation19 + $0x54] ss:$8 sps:$4 sm:$0xff]  }
 0x315   :  { %1280 = vmatprep.subr.bf16.mxu0 %v2571_v17  ;;  %v2654_v17 = vld [vmem:[#allocation19 + $0x50] ss:$8 sps:$4 sm:$0xff]  }
 0x316   :  { %v1053_v24 = vpop.f32.mrb[4].mxu1 }
 0x317   :  { %v1055_v25 = vpop.f32.mrb[5].mxu1  ;;  %v1054_v48 = vadd.f32 %v1053_v24, %v932_v45  ;;  %v2621_v45 = vld [vmem:[#allocation17 + $0x20] ss:$8 sps:$4 sm:$0xff]  }
 0x318   :  { %1281 = vmatpush1.bf16.msra.mxu0 %v2569_v20  ;;  %v1056_v27 = vadd.f32 %v1055_v25, %v936_v22  ;;  %v1057_v28 = vpop.f32.mrb[6].mxu1  ;;  %v2182_v20 = vld [vmem:[#allocation11] ss:$0 sm:$0xff] }
 0x319   :  { %1282 = vmatprep.subr.bf16.mxu0 %v2574_v23  ;;  %v1058_v30 = vpop.f32.mrb[7].mxu1  ;;  %v1060_v51 = vmax.f32 %v1054_v48, 0.0  ;;  %v2629_v48 = vld [vmem:[#allocation17 + $0x44] ss:$8 sps:$4 sm:$0xff]  }
 0x31a   :  { %v1061_v31 = vmax.f32 %v1056_v27, 0.0  ;;  %v1096_v27 = vld [vmem:[%s3468_s11] sm:$0x3] }
 0x31b   :  { %v1062_v52 = vpack.c.bf16 %v1060_v51, %v1060_v51  ;;  %v1101_v28 = vrot.slane %v1096_v27, %v3376_v19  ;;  %v2630_v51 = vld [vmem:[#allocation17 + $0x50] ss:$8 sps:$4 sm:$0xff]  }
 0x31c   :  { %1283 = vmatpush1.bf16.msra.mxu0 %v2572_v26  ;;  %v1063_v33 = vpack.c.bf16 %v1061_v31, %v1061_v31 }
 0x31d   :  { %1284 = vmatprep.subr.bf16.mxu0 %v2577_v29  ;;  %v1105_v29 = vrot.slane %v1096_v27, %v3381_v21 }
 0x31e   :  { %1300 = vmatprep.mubr.bf16.mxu0 %v1063_v33 }
 0x320   :  { %1285 = vmatpush1.bf16.msra.mxu0 %v2575_v32 }
 0x321   :  { %1286 = vmatprep.subr.bf16.mxu0 %v2580_v34 }
 0x324   :  { %1287 = vmatpush1.bf16.msra.mxu0 %v2578_v35 }
 0x325   :  { %1288 = vmatprep.subr.bf16.mxu0 %v2583_v36 }
 0x328   :  { %1289 = vmatpush1.bf16.msra.mxu0 %v2581_v38 }
 0x329   :  { %1290 = vmatprep.subr.bf16.mxu0 %v2586_v39 }
 0x32c   :  { %1291 = vmatpush1.bf16.msra.mxu0 %v2584_v40  ;;  %v2615_v40 = vld [vmem:[#allocation17] ss:$8 sps:$4 sm:$0xff]  }
 0x32d   :  { %1292 = vmatprep.subr.bf16.mxu0 %v2589_v41 }
 0x330   :  { %1293 = vmatpush1.bf16.msra.mxu0 %v2587_v42  ;;  %v2620_v42 = vld [vmem:[#allocation17 + $0x14] ss:$8 sps:$4 sm:$0xff]  }
 0x331   :  { %1294 = vmatprep.subr.bf16.mxu0 %v2592_v43  ;;  %v2618_v43 = vld [vmem:[#allocation17 + $0x10] ss:$8 sps:$4 sm:$0xff]  }
 0x334   :  { %1295 = vmatpush1.bf16.msra.mxu0 %v2590_v44  ;;  %v2623_v44 = vld [vmem:[#allocation17 + $0x24] ss:$8 sps:$4 sm:$0xff]  }
 0x335   :  { %1296 = vmatprep.subr.bf16.mxu0 %v2595_v46  ;;  %v2626_v46 = vld [vmem:[#allocation17 + $0x34] ss:$8 sps:$4 sm:$0xff]  }
 0x338   :  { %1297 = vmatpush1.bf16.msra.mxu0 %v2593_v47  ;;  %v2624_v47 = vld [vmem:[#allocation17 + $0x30] ss:$8 sps:$4 sm:$0xff]  }
 0x339   :  { %1298 = vmatprep.subr.bf16.mxu0 %v2598_v49  ;;  %v2627_v49 = vld [vmem:[#allocation17 + $0x40] ss:$8 sps:$4 sm:$0xff]  }
 0x33c   :  { %1299 = vmatpush1.bf16.msra.mxu0 %v2596_v50  ;;  %v2632_v50 = vld [vmem:[#allocation17 + $0x54] ss:$8 sps:$4 sm:$0xff]  }
 0x33d   :  { %1848 = vmatprep.subr.bf16.mxu0 %v2641_v7  ;;  %v2680_v7 = vld [vmem:[#allocation19 + $0xd4] ss:$8 sps:$4 sm:$0xff]  }
 0x33f   :  { %1301 = vmatmul.mubr.bf16.vlgmr.msra.gmra.mrb[8].mxu0 %v1062_v52  ;;  %v2635_v52 = vld [vmem:[#allocation17 + $0x64] ss:$8 sps:$4 sm:$0xff]  }
 0x340   :  { %1849 = vmatpush1.bf16.msra.mxu0 %v2639_v6  ;;  %v2675_v6 = vld [vmem:[#allocation19 + $0xc0] ss:$8 sps:$4 sm:$0xff]  }
 0x341   :  { %1850 = vmatprep.subr.bf16.mxu0 %v2644_v8  ;;  %v2678_v8 = vld [vmem:[#allocation19 + $0xd0] ss:$8 sps:$4 sm:$0xff]  }
 0x344   :  { %1851 = vmatpush1.bf16.msra.mxu0 %v2642_v9  ;;  %v2683_v9 = vld [vmem:[#allocation19 + $0xe4] ss:$8 sps:$4 sm:$0xff]  }
 0x345   :  { %1852 = vmatprep.subr.bf16.mxu0 %v2647_v10  ;;  %v2681_v10 = vld [vmem:[#allocation19 + $0xe0] ss:$8 sps:$4 sm:$0xff]  }
 0x348   :  { %1853 = vmatpush1.bf16.msra.mxu0 %v2645_v11  ;;  %v2686_v11 = vld [vmem:[#allocation19 + $0xf4] ss:$8 sps:$4 sm:$0xff]  }
 0x349   :  { %1854 = vmatprep.subr.bf16.mxu0 %v2650_v12  ;;  %v2684_v12 = vld [vmem:[#allocation19 + $0xf0] ss:$8 sps:$4 sm:$0xff]  }
 0x34c   :  { %1855 = vmatpush1.bf16.msra.mxu0 %v2648_v13  ;;  %v2687_v13 = vld [vmem:[#allocation20 + $0x40] sm:$0xff]  }
 0x34d   :  { %1856 = vmatprep.subr.bf16.mxu0 %v2653_v14  ;;  %v2688_v14 = vld [vmem:[#allocation20] sm:$0xff]  }
 0x350   :  { %1857 = vmatpush1.bf16.msra.mxu0 %v2651_v15  ;;  %v2689_v15 = vld [vmem:[#allocation20 + $0x48] sm:$0xff]  }
 0x351   :  { %1858 = vmatprep.subr.bf16.mxu0 %v2656_v16  ;;  %v2690_v16 = vld [vmem:[#allocation20 + $0x8] sm:$0xff]  }
 0x354   :  { %1859 = vmatpush1.bf16.msra.mxu0 %v2654_v17  ;;  %v2691_v17 = vld [vmem:[#allocation20 + $0x50] sm:$0xff]  }
 0x355   :  { %1860 = vmatprep.subr.bf16.mxu0 %v2659_v57 }
 0x358   :  { %1861 = vmatpush1.bf16.msra.mxu0 %v2657_v58 }
 0x359   :  { %1862 = vmatprep.subr.bf16.mxu0 %v2662_v59 }
 0x35c   :  { %1863 = vmatpush1.bf16.msra.mxu0 %v2660_v60 }
 0x35d   :  { %1864 = vmatprep.subr.bf16.mxu0 %v2665_v62 }
 0x360   :  { %1865 = vmatpush1.bf16.msra.mxu0 %v2663_v61 }
 0x361   :  { %1866 = vmatprep.subr.bf16.mxu0 %v2668_v63 }
 0x364   :  { %1867 = vmatpush1.bf16.msra.mxu0 %v2666_v0 }
 0x365   :  { %1868 = vmatprep.subr.bf16.mxu0 %v2671_v1 }
 0x368   :  { %1869 = vmatpush1.bf16.msra.mxu0 %v2669_v2 }
 0x369   :  { %1870 = vmatprep.subr.bf16.mxu0 %v2674_v3 }
 0x36c   :  { %1871 = vmatpush1.bf16.msra.mxu0 %v2672_v4 }
 0x36d   :  { %1872 = vmatprep.subr.bf16.mxu0 %v2677_v5 }
 0x370   :  { %1873 = vmatpush1.bf16.msra.mxu0 %v2675_v6 }
 0x371   :  { %1874 = vmatprep.subr.bf16.mxu0 %v2680_v7 }
 0x374   :  { %1875 = vmatpush1.bf16.msra.mxu0 %v2678_v8 }
 0x375   :  { %1876 = vmatprep.subr.bf16.mxu0 %v2683_v9 }
 0x378   :  { %1877 = vmatpush1.bf16.msra.mxu0 %v2681_v10 }
 0x379   :  { %1878 = vmatprep.subr.bf16.mxu0 %v2686_v11 }
 0x37c   :  { %1879 = vmatpush1.bf16.msra.mxu0 %v2684_v12 }
 0x3d2   :  { %v2345_v18 = vpop.f32.mrb[4].mxu0 }
 0x3d3   :  { %v2346_v22 = vpop.f32.mrb[5].mxu0 }
 0x3d4   :  { %v2347_v23 = vadd.f32 %v2346_v22, %v2345_v18  ;;  %v2348_v24 = vpop.f32.mrb[6].mxu0  ;;  %v2692_v18 = vld [vmem:[#allocation20 + $0x10] sm:$0xff]   ;;  %v2694_v22 = vld [vmem:[#allocation20 + $0x18] sm:$0xff]  }
 0x3d5   :  { %v2349_v25 = vpop.f32.mrb[7].mxu0  ;;  %v2696_v24 = vld [vmem:[#allocation20 + $0x20] sm:$0xff]  }
 0x3d6   :  { %v903_v26 = vadd.f32 %v2347_v23, %v2182_v20  ;;  %v2693_v20 = vld [vmem:[#allocation20 + $0x58] sm:$0xff]   ;;  %v2695_v23 = vld [vmem:[#allocation20 + $0x60] sm:$0xff]   ;;  %v2697_v25 = vld [vmem:[#allocation20 + $0x68] sm:$0xff]  }
 0x3d8   :  { %908 = vst [vmem:[#allocation22] sm:$0xff] %v903_v26  ;;  %v2698_v26 = vld [vmem:[#allocation20 + $0x28] sm:$0xff]  }
 0x412   :  { %v1302_v30 = vpop.f32.mrb[8].mxu0 }
 0x413   :  { %v1303_v31 = vadd.f32 %v1302_v30, %v1101_v28  ;;  %v1304_v32 = vpop.f32.mrb[9].mxu0  ;;  %v2247_v28 = vld [vmem:[%s3470_s13] ss:$0 sm:$0xff] }
 0x414   :  { %v1305_v33 = vadd.f32 %v1304_v32, %v1105_v29  ;;  %v1306_v34 = vpop.f32.mrb[10].mxu0 }
 0x415   :  { %v1309_v35 = vmax.f32 %v1303_v31, 0.0  ;;  %v1307_v36 = vpop.f32.mrb[11].mxu0  ;;  %v1507_v34 = vld [vmem:[%s3473_s16] sm:$0x3] }
 0x416   :  { %v1310_v38 = vmax.f32 %v1305_v33, 0.0  ;;  %v1516_v36 = vrot.slane %v1507_v34, %v3381_v21 }
 0x417   :  { %v1311_v41 = vpack.c.bf16 %v1309_v35, %v1309_v35  ;;  %v1512_v35 = vrot.slane %v1507_v34, %v3376_v19 }
 0x418   :  { %v1312_v39 = vpack.c.bf16 %v1310_v38, %v1310_v38 }
 0x41a   :  { %1480 = vmatprep.mubr.bf16.mxu1 %v1312_v39 }
 0x41b   :  { %1481 = vmatmul.mubr.bf16.vlgmr.msra.gmra.mrb[8].mxu1 %v1311_v41 }
 0x41c   :  { %1600 = vmatpush1.bf16.msra.mxu1 %v2615_v40  ;;  %1631 = vmatprep.mubr.bf16.mxu1 %v3067_v37  ;;  %v2633_v37 = vld [vmem:[#allocation17 + $0x60] ss:$8 sps:$4 sm:$0xff]  }
 0x41d   :  { %1601 = vmatprep.subr.bf16.mxu1 %v2620_v42 }
 0x420   :  { %1602 = vmatpush1.bf16.msra.mxu1 %v2618_v43 }
 0x421   :  { %1603 = vmatprep.subr.bf16.mxu1 %v2623_v44 }
 0x424   :  { %1604 = vmatpush1.bf16.msra.mxu1 %v2621_v45 }
 0x425   :  { %1605 = vmatprep.subr.bf16.mxu1 %v2626_v46 }
 0x428   :  { %1606 = vmatpush1.bf16.msra.mxu1 %v2624_v47 }
 0x429   :  { %1607 = vmatprep.subr.bf16.mxu1 %v2629_v48  ;;  %v2699_v48 = vld [vmem:[#allocation20 + $0x70] sm:$0xff]  }
 0x42c   :  { %1608 = vmatpush1.bf16.msra.mxu1 %v2627_v49  ;;  %v2700_v49 = vld [vmem:[#allocation20 + $0x30] sm:$0xff]  }
 0x42d   :  { %1609 = vmatprep.subr.bf16.mxu1 %v2632_v50  ;;  %v2701_v50 = vld [vmem:[#allocation20 + $0x78] sm:$0xff]  }
 0x430   :  { %1610 = vmatpush1.bf16.msra.mxu1 %v2630_v51  ;;  %v2702_v51 = vld [vmem:[#allocation20 + $0x38] sm:$0xff]  }
 0x431   :  { %1611 = vmatprep.subr.bf16.mxu1 %v2635_v52  ;;  %v1676_v52 = vld [vmem:[%s3475_s18] sm:$0x3]  ;;  %s3069_s18 = smov [#allocation22]  }
 0x432   :  { %s2076_s21 = sshll.u32 %s3069_s18, 4  ;;  %s2077_s21 = int_to_ptr.vmem [resolvable:$true] %s2076_s21 }
 0x434   :  { %1612 = vmatpush1.bf16.msra.mxu1 %v2633_v37  ;;  %v1681_v37 = vrot.slane %v1676_v52, %v3376_v19 }
 0x435   :  { %1613 = vmatprep.subr.bf16.mxu1 %v2638_v53  ;;  %v1685_v53 = vrot.slane %v1676_v52, %v3381_v21 }
 0x438   :  { %1614 = vmatpush1.bf16.msra.mxu1 %v2636_v54 }
 0x439   :  { %2373 = vmatprep.subr.bf16.mxu1 %v2687_v13 }
 0x43b   :  { %1632 = vmatmul.mubr.bf16.vlgmr.msra.gmra.mrb[12].mxu1 %v1490_v56 }
 0x43c   :  { %2374 = vmatpush3.bf16.msra.mxu1 %v2688_v14 }
 0x43d   :  { %2375 = vmatprep.subr.bf16.mxu1 %v2689_v15 }
 0x440   :  { %2376 = vmatpush3.bf16.msra.mxu1 %v2690_v16 }
 0x441   :  { %2377 = vmatprep.subr.bf16.mxu1 %v2691_v17 }
 0x444   :  { %2378 = vmatpush3.bf16.msra.mxu1 %v2692_v18 }
 0x445   :  { %2379 = vmatprep.subr.bf16.mxu1 %v2693_v20 }
 0x448   :  { %2380 = vmatpush3.bf16.msra.mxu1 %v2694_v22 }
 0x449   :  { %2381 = vmatprep.subr.bf16.mxu1 %v2695_v23 }
 0x44c   :  { %2382 = vmatpush3.bf16.msra.mxu1 %v2696_v24 }
 0x44d   :  { %2383 = vmatprep.subr.bf16.mxu1 %v2697_v25 }
 0x450   :  { %2384 = vmatpush3.bf16.msra.mxu1 %v2698_v26 }
 0x451   :  { %2385 = vmatprep.subr.bf16.mxu1 %v2699_v48 }
 0x454   :  { %2386 = vmatpush3.bf16.msra.mxu1 %v2700_v49 }
 0x455   :  { %2387 = vmatprep.subr.bf16.mxu1 %v2701_v50 }
 0x458   :  { %2388 = vmatpush3.bf16.msra.mxu1 %v2702_v51 }
 0x4ee   :  { %v2367_v27 = vpop.f32.mrb[8].mxu1 }
 0x4ef   :  { %v2368_v29 = vpop.f32.mrb[9].mxu1 }
 0x4f0   :  { %v2369_v30 = vadd.f32 %v2368_v29, %v2367_v27  ;;  %v2370_v31 = vpop.f32.mrb[10].mxu1 }
 0x4f1   :  { %v2371_v32 = vpop.f32.mrb[11].mxu1 }
 0x4f2   :  { %v1483_v33 = vadd.f32 %v2369_v30, %v2247_v28 }
 0x4f4   :  { %1488 = vst [vmem:[#allocation23] sm:$0xff] %v1483_v33 }
 0x50e   :  { %v1633_v38 = vpop.f32.mrb[12].mxu1 }
 0x50f   :  { %v1634_v39 = vadd.f32 %v1633_v38, %v1512_v35  ;;  %v1635_v40 = vpop.f32.mrb[13].mxu1 }
 0x510   :  { %v1636_v41 = vadd.f32 %v1635_v40, %v1516_v36  ;;  %v1637_v42 = vpop.f32.mrb[14].mxu1 }
 0x511   :  { %v1640_v43 = vmax.f32 %v1634_v39, 0.0  ;;  %v1638_v44 = vpop.f32.mrb[15].mxu1 }
 0x512   :  { %v1641_v45 = vmax.f32 %v1636_v41, 0.0 }
 0x513   :  { %v1642_v47 = vpack.c.bf16 %v1640_v43, %v1640_v43 }
 0x514   :  { %v1643_v46 = vpack.c.bf16 %v1641_v45, %v1641_v45 }
 0x516   :  { %1880 = vmatprep.mubr.bf16.mxu0 %v1643_v46 }
 0x517   :  { %1881 = vmatmul.mubr.bf16.vlgmr.msra.gmra.mrb[12].mxu0 %v1642_v47 }
 0x5ea   :  { %v1882_v54 = vpop.f32.mrb[12].mxu0 }
 0x5eb   :  { %v1883_v55 = vadd.f32 %v1882_v54, %v1681_v37  ;;  %v1884_v56 = vpop.f32.mrb[13].mxu0 }
 0x5ec   :  { %v1885_v57 = vadd.f32 %v1884_v56, %v1685_v53  ;;  %v1886_v58 = vpop.f32.mrb[14].mxu0 }
 0x5ed   :  { %v1889_v59 = vmax.f32 %v1883_v55, 0.0  ;;  %v1887_v60 = vpop.f32.mrb[15].mxu0 }
 0x5ee   :  { %v1890_v61 = vmax.f32 %v1885_v57, 0.0 }
 0x5ef   :  { %v1891_v63 = vpack.c.bf16 %v1889_v59, %v1889_v59 }
 0x5f0   :  { %v1892_v62 = vpack.c.bf16 %v1890_v61, %v1890_v61 }
 0x5f2   :  { %2060 = vmatprep.mubr.bf16.mxu1 %v1892_v62 }
 0x5f3   :  { %2061 = vmatmul.mubr.bf16.vlgmr.msra.gmra.mrb[16].mxu1 %v1891_v63 }
 0x5f4   :  { %2978 = shalt.err (!%p2975_p2)
}
 0x5f5   :  { %s2979_s27 = scalar_lea.hbm %s3479_s22, 128 }
 0x5f6   :  { %p2980_p3 = scmp.ne.s32.totalorder %s3479_s22, %s2979_s27  ;;  %p2983_p4 = scmp.lt.u32.totalorder %s2979_s27, %s3479_s22 }
 0x5f8   :  { %p2985_p5 = pnand %p2983_p4, %p2980_p3 }
 0x5fa   :  { %2988 = shalt.err (!%p2985_p5)
}
 0x5fb   :  { %2089 = dma.vmem_to_hbm [thread:$0]  %s2087_s20, 128, %s3479_s22, [#allocation24]  }
 0x5fc   :  { %s2989_s1 = scalar_lea.vmem %s2077_s21, 128  ;;  %p2994_p7 = scmp.lt.s32.totalorder %s2077_s21, %s2077_s21 }
 0x5fd   :  { %p2990_p6 = scmp.ne.s32.totalorder %s2077_s21, %s2989_s1  ;;  %p2995_p8 = scmp.lt.s32.totalorder %s2989_s1, %s2989_s1 }
 0x5ff   :  { %p2996_p9 = por %p2995_p8, %p2994_p7 }
 0x601   :  { %p2997_p10 = pnand %p2996_p9, %p2990_p6 }
 0x603   :  { %3000 = shalt.err (!%p2997_p10)
}
 0x604   :  { %s3508_s0 = sld [smem:[#allocation44_spill]] }
 0x60a   :  { %s3001_s7 = scalar_lea.hbm %s3508_s0, 128 }
 0x60b   :  { %p3002_p11 = scmp.ne.s32.totalorder %s3508_s0, %s3001_s7  ;;  %p3005_p12 = scmp.lt.u32.totalorder %s3001_s7, %s3508_s0 }
 0x60d   :  { %p3007_p13 = pnand %p3005_p12, %p3002_p11 }
 0x60f   :  { %3010 = shalt.err (!%p3007_p13)
}
 0x610   :  { %2079 = dma.vmem_to_hbm [thread:$0]  %s2077_s21, 128, %s3508_s0, [#allocation4]   ;;  %vm2068_vm0 = vcmask 523264  }
 0x611   :  { %s3509_s12 = sld [smem:[#allocation43_spill]]  ;;  %s3070_s3 = smov [#allocation25]  }
 0x612   :  { %s2096_s13 = sshll.u32 %s3070_s3, 4  ;;  %s2097_s13 = int_to_ptr.vmem [resolvable:$true] %s2096_s13 }
 0x613   :  { %s3011_s16 = scalar_lea.vmem %s2097_s13, 128  ;;  %p3016_p1 = scmp.lt.s32.totalorder %s2097_s13, %s2097_s13 }
 0x614   :  { %p3012_p0 = scmp.ne.s32.totalorder %s2097_s13, %s3011_s16  ;;  %p3017_p2 = scmp.lt.s32.totalorder %s3011_s16, %s3011_s16 }
 0x616   :  { %p3018_p3 = por %p3017_p2, %p3016_p1 }
 0x617   :  { %v2312_v21 = vld [vmem:[%s3509_s12] ss:$0 sm:$0xff] }
 0x618   :  { %p3019_p4 = pnand %p3018_p3, %p3012_p0 }
 0x6c6   :  { %v2389_v19 = vpop.f32.mrb[16].mxu1 }
 0x6c7   :  { %v2390_v0 = vpop.f32.mrb[17].mxu1 }
 0x6c8   :  { %v2391_v1 = vadd.f32 %v2390_v0, %v2389_v19  ;;  %v2392_v2 = vpop.f32.mrb[18].mxu1 }
 0x6c9   :  { %v2393_v3 = vpop.f32.mrb[19].mxu1 }
 0x6ca   :  { %v2063_v4 = vadd.f32 %v2391_v1, %v2312_v21 }
 0x6cc   :  { %2069 = vst.msk [vmem:[#allocation25] sm:$0xff] %vm2068_vm0, %v2063_v4 }
 0x6cd   :  { %3022 = shalt.err (!%p3019_p4)
}
 0x6ce   :  { %s3510_s18 = sld [smem:[#allocation45_spill]] }
 0x6d4   :  { %s3023_s21 = scalar_lea.hbm %s3510_s18, 128 }
 0x6d5   :  { %p3024_p5 = scmp.ne.s32.totalorder %s3510_s18, %s3023_s21  ;;  %p3027_p6 = scmp.lt.u32.totalorder %s3023_s21, %s3510_s18 }
 0x6d7   :  { %p3029_p7 = pnand %p3027_p6, %p3024_p5 }
 0x6d9   :  { %3032 = shalt.err (!%p3029_p7)
}
 0x6da   :  { %2099 = dma.vmem_to_hbm [thread:$0]  %s2097_s13, 128, %s3510_s18, [#allocation24]  }
 0x6db   :  { %3047 = dma.done.wait [#allocation4], 128  }
 0x6dc   :  { %3048 = vsyncadd [#allocation4], 4294967168 }
 0x6dd   :  { %3049 = dma.done.wait [#allocation24], 256  }
 0x6de   :  { %3050 = vsyncadd [#allocation24], 4294967040 }
 0x6df   :  { %2109 = vsyncpa [#allocation3], 1 }
 0x6e0   :  { %2110 = vsyncpa [#allocation6], 1 }
 0x6e1   :  { %2111 = vsyncpa [#allocation9], 1 }
 0x6e2   :  { %2112 = vsyncpa [#allocation12], 1 }
 0x6e3   :  { %2113 = vsyncpa [#allocation15], 1 }
 0x6e4   :  { %2114 = vsyncpa [#allocation18], 1 }
 0x6e5   :  { %2115 = vsyncpa [#allocation21], 1 }
 0x6e6   :  { %2116 = vsyncpa [#allocation4], 1 }
 0x6e7   :  { %2117 = vsyncpa [#allocation24], 1 }

</bundles_post_ra>
